<compile_context>
chip_gen: v7x
topology: tpu7x:2x2x1
jax: 0.10.0
libtpu: 0.0.40
codegen_flags: <defaults>
</compile_context>

<pallas_src>
import functools
import math

import jax
import jax.numpy as jnp
from jax.experimental import pallas as pl
from jax.experimental.pallas import tpu as pltpu


# ----------------------------- fused Pallas kernel ---------------------------

def _filter_init_kernel(x_ref, w_ref, b_ref, p_ref, o_ref, *, ksz, Ho, Wo, nbins):
    img = pl.program_id(1)

    @pl.when(img == 0)
    def _init():
        o_ref[...] = jnp.zeros_like(o_ref)

    cin = x_ref.shape[-1]
    cout = w_ref.shape[-1]

    # Padded NHWC activation for this sample (read once from HBM as bf16).
    x = x_ref[0].astype(jnp.float32)                    # (Ho+ksz-1, Wo+ksz-1, Cin)

    # Convolution: fold the ksz*ksz taps into the K reduction (in VMEM only).
    # Each tap is a shifted window -> (Ho*Wo, Cin) bf16 MXU matmul, f32 acc.
    y = jnp.zeros((Ho * Wo, cout), jnp.float32)
    for kh in range(ksz):
        for kw in range(ksz):
            tap = x[kh:kh + Ho, kw:kw + Wo, :].reshape(Ho * Wo, cin)
            w_tap = w_ref[(kh * ksz + kw) * cin:(kh * ksz + kw + 1) * cin, :]
            y = y + jnp.dot(tap.astype(jnp.bfloat16), w_tap,
                            preferred_element_type=jnp.float32)
    y = y + b_ref[...]                                  # fused conv bias

    # Exact PrRoI pooling: per-bin weighted reduction over the spatial axis.
    # 1/bin_area, 1/num_images and the filter_norm factor are pre-folded into p.
    p = p_ref[0]                                        # (Ho*Wo, nbins) f32
    bins = [jnp.sum(y * p[:, b:b + 1], axis=0, keepdims=True) for b in range(nbins)]
    pooled = bins[0] if nbins == 1 else jnp.concatenate(bins, axis=0)   # (nbins, Cout)

    # Mean over images: the output block is resident across the inner grid axis.
    o_ref[...] += pooled[None]


def _fused_filter_init(x_pad, w_mat, bias, pmap, *, num_seq, num_images, ksz, Ho, Wo):
    R, Hp, Wp, Cin = x_pad.shape
    K, Cout = w_mat.shape
    nbins = pmap.shape[-1]
    kernel = functools.partial(_filter_init_kernel, ksz=ksz, Ho=Ho, Wo=Wo, nbins=nbins)
    return pl.pallas_call(
        kernel,
        out_shape=jax.ShapeDtypeStruct((num_seq, nbins, Cout), jnp.float32),
        grid_spec=pltpu.PrefetchScalarGridSpec(
            num_scalar_prefetch=0,
            grid=(num_seq, num_images),
            in_specs=[
                pl.BlockSpec((1, Hp, Wp, Cin), lambda s, i: (i * num_seq + s, 0, 0, 0)),
                pl.BlockSpec((K, Cout), lambda s, i: (0, 0)),
                pl.BlockSpec((1, Cout), lambda s, i: (0, 0)),
                pl.BlockSpec((1, Ho * Wo, nbins), lambda s, i: (i * num_seq + s, 0, 0)),
            ],
            out_specs=pl.BlockSpec((1, nbins, Cout), lambda s, i: (s, 0, 0)),
        ),
        compiler_params=pltpu.CompilerParams(
            dimension_semantics=("parallel", "arbitrary"),
            vmem_limit_bytes=32 * 1024 * 1024),
    )(x_pad, w_mat, bias, pmap)


# ------------------------ PrRoI pooling coefficients -------------------------

def _hat_cdf(t):
    # Antiderivative of the unit hat function max(0, 1 - |t|), evaluated at t.
    t = jnp.clip(t, -1.0, 1.0)
    return jnp.where(t < 0.0, 0.5 * (t + 1.0) ** 2, 1.0 - 0.5 * (1.0 - t) ** 2)


def _prroi_pool_maps(bb, *, H, W, filter_size, feature_stride, pool_square):
    """Exact PrRoIPool2D coefficient maps.

    Returns pmap (R, fs*fs, H*W) such that
        pooled[r, c, ph, pw] = sum_{h,w} feat[r, c, h, w] * pmap[r, ph*fs+pw, h*W+w]
    equals PrRoIPool2D(fs, fs, 1/feature_stride) (integral of the bilinear
    interpolant over each bin / bin area; degenerate bins -> 0).
    """
    fs = filter_size
    bb = bb.reshape(-1, 4).astype(jnp.float32)
    x0, y0, bw, bh = bb[:, 0], bb[:, 1], bb[:, 2], bb[:, 3]
    if pool_square:
        sz = jnp.sqrt(bw * bh)
        x0 = x0 + bw * 0.5 - sz * 0.5
        y0 = y0 + bh * 0.5 - sz * 0.5
        bw = sz
        bh = sz
    scale = 1.0 / float(feature_stride)
    sx, sy = x0 * scale, y0 * scale
    ex, ey = (x0 + bw) * scale, (y0 + bh) * scale
    roi_w = jnp.maximum(ex - sx, 0.0)
    roi_h = jnp.maximum(ey - sy, 0.0)
    bin_w = roi_w / fs
    bin_h = roi_h / fs
    pidx = jnp.arange(fs, dtype=jnp.float32)
    ws_h = sy[:, None] + bin_h[:, None] * pidx[None, :]            # (R, fs)
    we_h = ws_h + bin_h[:, None]
    ws_w = sx[:, None] + bin_w[:, None] * pidx[None, :]
    we_w = ws_w + bin_w[:, None]
    hh = jnp.arange(H, dtype=jnp.float32)
    ww = jnp.arange(W, dtype=jnp.float32)
    a_h = _hat_cdf(we_h[:, :, None] - hh) - _hat_cdf(ws_h[:, :, None] - hh)   # (R, fs, H)
    a_w = _hat_cdf(we_w[:, :, None] - ww) - _hat_cdf(ws_w[:, :, None] - ww)   # (R, fs, W)
    win = bin_w * bin_h
    inv = jnp.where(win > 0, 1.0 / jnp.maximum(win, 1e-30), 0.0)              # (R,)
    pmap = jnp.einsum('rph,rqw->rpqhw', a_h, a_w).reshape(bb.shape[0], fs * fs, H * W)
    return pmap * inv[:, None, None]


# ------------------------------ module wrapper --------------------------------

def init_params(key, *, feature_dim=128, conv_ksz=3):
    # Matches the module's Conv2d init: weight ~ N(0, sqrt(2/(k*k*Cout))), bias = 0.
    n = conv_ksz * conv_ksz * feature_dim
    w = math.sqrt(2.0 / n) * jax.random.normal(
        key, (feature_dim, feature_dim, conv_ksz, conv_ksz), jnp.float32)
    b = jnp.zeros((feature_dim,), jnp.float32)
    # Hoisted per-call constant: (kh, kw, Cin, Cout) -> (k*k*Cin, Cout), bf16 for the MXU.
    w_mat = jnp.transpose(w, (2, 3, 1, 0)).reshape(
        conv_ksz * conv_ksz * feature_dim, feature_dim).astype(jnp.bfloat16)
    return {'w': w, 'b': b, 'w_mat': w_mat}


@functools.partial(jax.jit, static_argnames=(
    "filter_size", "feature_stride", "pool_square", "filter_norm", "conv_ksz"))
def filter_initializer_forward(params, feat, bb, *, filter_size=1, feature_stride=16,
                               pool_square=False, filter_norm=True, conv_ksz=3):
    """feat (num_images, [S], C, H, W), bb (num_images, [S], 4) -> (S, C, fs, fs)."""
    num_images = feat.shape[0]
    num_seq = feat.shape[1] if feat.ndim == 5 else 1
    C, H, W = feat.shape[-3:]
    R = num_images * num_seq
    fs = filter_size
    pad = conv_ksz // 2

    x = jnp.transpose(feat.reshape(R, C, H, W).astype(jnp.float32), (0, 2, 3, 1))
    x_pad = jnp.pad(x.astype(jnp.bfloat16),
                    ((0, 0), (pad, pad), (pad, pad), (0, 0)))          # NHWC, bf16

    pmap = _prroi_pool_maps(bb, H=H, W=W, filter_size=fs,
                            feature_stride=feature_stride, pool_square=pool_square)
    extra = 1.0 / float(num_images)                   # mean over images
    if filter_norm:
        extra = extra / float(C * fs * fs)            # filter_norm
    pmap_k = jnp.transpose(pmap * extra, (0, 2, 1)).astype(jnp.float32)  # (R, H*W, fs*fs)

    out = _fused_filter_init(x_pad, params['w_mat'],
                             params['b'].reshape(1, C).astype(jnp.float32),
                             pmap_k,
                             num_seq=num_seq, num_images=num_images,
                             ksz=conv_ksz, Ho=H, Wo=W)                 # (S, fs*fs, C)
    return jnp.transpose(out.reshape(num_seq, fs, fs, C), (0, 3, 1, 2))


# ------------------------------ pure-JAX reference ----------------------------

def reference_forward(params, feat, bb, *, filter_size=1, feature_stride=16,
                      pool_square=False, filter_norm=True, conv_ksz=3):
    num_images = feat.shape[0]
    num_seq = feat.shape[1] if feat.ndim == 5 else 1
    C, H, W = feat.shape[-3:]
    R = num_images * num_seq
    fs = filter_size
    x = feat.reshape(R, C, H, W).astype(jnp.float32)
    # Same bf16 input rounding as the kernel, exact f32 accumulation.
    xb = x.astype(jnp.bfloat16).astype(jnp.float32)
    wb = params['w'].astype(jnp.bfloat16).astype(jnp.float32)
    y = jax.lax.conv_general_dilated(
        xb, wb, window_strides=(1, 1),
        padding=[(conv_ksz // 2, conv_ksz // 2)] * 2,
        dimension_numbers=('NCHW', 'OIHW', 'NCHW'),
        precision=jax.lax.Precision.HIGHEST)
    y = y + params['b'][None, :, None, None]
    pmap = _prroi_pool_maps(bb, H=H, W=W, filter_size=fs,
                            feature_stride=feature_stride, pool_square=pool_square)
    pooled = jnp.einsum('rbq,rcq->rbc', pmap, y.reshape(R, C, H * W))
    pooled = pooled.reshape(num_images, num_seq, fs * fs, C).mean(axis=0)
    if filter_norm:
        pooled = pooled / (C * fs * fs)
    return jnp.transpose(pooled.reshape(num_seq, fs, fs, C), (0, 3, 1, 2))


# ----------------------------------- main -------------------------------------

if __name__ == "__main__":
    key = jax.random.PRNGKey(0)
    k_param, k_feat, k_xy, k_wh = jax.random.split(key, 4)

    num_images, num_seq = 2, 2
    feat_dim, H, W = 128, 16, 16
    cfg = dict(filter_size=1, feature_stride=16, pool_square=False,
               filter_norm=True, conv_ksz=3)

    params = init_params(k_param, feature_dim=feat_dim, conv_ksz=cfg['conv_ksz'])
    feat = jax.random.normal(k_feat, (num_images, num_seq, feat_dim, H, W), jnp.float32)
    # (x, y, w, h) target boxes in image coordinates (image is H*stride x W*stride).
    xy = jax.random.uniform(k_xy, (num_images, num_seq, 2), jnp.float32, 10.0, 110.0)
    wh = jax.random.uniform(k_wh, (num_images, num_seq, 2), jnp.float32, 40.0, 130.0)
    bb = jnp.concatenate([xy, wh], axis=-1)

    out = filter_initializer_forward(params, feat, bb, **cfg)
    out = jax.block_until_ready(out)
    assert out.shape == (num_seq, feat_dim, cfg['filter_size'], cfg['filter_size'])
    assert bool(jnp.all(jnp.isfinite(out)))

    ref = jax.block_until_ready(reference_forward(params, feat, bb, **cfg))
    err = float(jnp.max(jnp.abs(out - ref)))
    tol = 2e-2 * float(jnp.max(jnp.abs(ref))) + 1e-6
    assert err <= tol, f"kernel/reference mismatch: {err} > {tol}"
    print("KERNEL_OK")
</pallas_src>

<mosaic_0001>
module attributes {stable_mosaic.version = 11 : i64} {
  func.func @_filter_init_kernel(%arg0: i32, %arg1: i32, %arg2: memref<1x18x18x128xbf16, #tpu.memory_space<vmem>>, %arg3: memref<1152x128xbf16, #tpu.memory_space<vmem>>, %arg4: memref<1x128xf32, #tpu.memory_space<vmem>>, %arg5: memref<1x256x1xf32, #tpu.memory_space<vmem>>, %arg6: memref<1x1x128xf32, #tpu.memory_space<vmem>>) attributes {dimension_semantics = [#tpu.dimension_semantics<parallel>, #tpu.dimension_semantics<arbitrary>], iteration_bounds = array<i64: 2, 2>, scalar_prefetch = 0 : i64, scratch_operands = 0 : i64, tpu.core_type = #tpu.core_type<tc>, window_params = [{transform_indices = @transform_0, window_bounds = array<i64: 1, 18, 18, 128>}, {pipeline_mode = #tpu.pipeline_mode<synchronous>, transform_indices = @transform_1, window_bounds = array<i64: 1152, 128>}, {pipeline_mode = #tpu.pipeline_mode<synchronous>, transform_indices = @transform_2, window_bounds = array<i64: 1, 128>}, {transform_indices = @transform_3, window_bounds = array<i64: 1, 256, 1>}, {transform_indices = @transform_4, window_bounds = array<i64: 1, 1, 128>}]} {
    %c0_i32 = arith.constant 0 : i32
    %0 = arith.cmpi eq, %arg1, %c0_i32 : i32
    %1 = arith.extui %0 : i1 to i32
    %c0_i32_0 = arith.constant 0 : i32
    %2 = arith.cmpi ne, %1, %c0_i32_0 : i32
    scf.if %2 {
      %cst_35 = arith.constant 0.000000e+00 : f32
      %74 = vector.broadcast %cst_35 : f32 to vector<1x1x128xf32>
      %c0_36 = arith.constant 0 : index
      %c0_37 = arith.constant 0 : index
      %c0_38 = arith.constant 0 : index
      %75 = vector.load %arg6[%c0_36, %c0_37, %c0_38] : memref<1x1x128xf32, #tpu.memory_space<vmem>>, vector<1x1x128xf32>
      tpu.vector_store %arg6[%c0_36, %c0_37, %c0_38], %74 {strides = array<i32>} : memref<1x1x128xf32, #tpu.memory_space<vmem>>, vector<1x1x128xf32>,
    } else {
    }
    %c0 = arith.constant 0 : index
    %c0_1 = arith.constant 0 : index
    %c0_2 = arith.constant 0 : index
    %c0_3 = arith.constant 0 : index
    %3 = vector.load %arg2[%c0, %c0_1, %c0_2, %c0_3] : memref<1x18x18x128xbf16, #tpu.memory_space<vmem>>, vector<1x18x18x128xbf16>
    %4 = vector.shape_cast %3 : vector<1x18x18x128xbf16> to vector<18x18x128xbf16>
    %5 = arith.extf %4 : vector<18x18x128xbf16> to vector<18x18x128xf32>
    %cst = arith.constant 0.000000e+00 : f32
    %6 = vector.broadcast %cst : f32 to vector<256x128xf32>
    %7 = vector.extract_strided_slice %5 {offsets = [0, 0, 0], sizes = [16, 16, 128], strides = [1, 1, 1]} : vector<18x18x128xf32> to vector<16x16x128xf32>
    %8 = vector.shape_cast %7 : vector<16x16x128xf32> to vector<256x128xf32>
    %c0_4 = arith.constant 0 : index
    %c0_5 = arith.constant 0 : index
    %9 = vector.load %arg3[%c0_4, %c0_5] : memref<1152x128xbf16, #tpu.memory_space<vmem>>, vector<128x128xbf16>
    %10 = arith.truncf %8 : vector<256x128xf32> to vector<256x128xbf16>
    %cst_6 = arith.constant dense<0.000000e+00> : vector<256x128xf32>
    %11 = tpu.matmul %10, %9, %cst_6 {dimension_numbers = #tpu.dot_dimension_numbers<[1], [0], [0], [1], [0, 0, 1, 1], [], []>} : vector<256x128xbf16>, vector<128x128xbf16>, vector<256x128xf32> -> vector<256x128xf32>
    %12 = arith.addf %6, %11 : vector<256x128xf32>
    %13 = vector.extract_strided_slice %5 {offsets = [0, 1, 0], sizes = [16, 16, 128], strides = [1, 1, 1]} : vector<18x18x128xf32> to vector<16x16x128xf32>
    %14 = vector.shape_cast %13 : vector<16x16x128xf32> to vector<256x128xf32>
    %c128 = arith.constant 128 : index
    %c0_7 = arith.constant 0 : index
    %15 = vector.load %arg3[%c128, %c0_7] : memref<1152x128xbf16, #tpu.memory_space<vmem>>, vector<128x128xbf16>
    %16 = arith.truncf %14 : vector<256x128xf32> to vector<256x128xbf16>
    %cst_8 = arith.constant dense<0.000000e+00> : vector<256x128xf32>
    %17 = tpu.matmul %16, %15, %cst_8 {dimension_numbers = #tpu.dot_dimension_numbers<[1], [0], [0], [1], [0, 0, 1, 1], [], []>} : vector<256x128xbf16>, vector<128x128xbf16>, vector<256x128xf32> -> vector<256x128xf32>
    %18 = arith.addf %12, %17 : vector<256x128xf32>
    %19 = vector.extract_strided_slice %5 {offsets = [0, 2, 0], sizes = [16, 16, 128], strides = [1, 1, 1]} : vector<18x18x128xf32> to vector<16x16x128xf32>
    %20 = vector.shape_cast %19 : vector<16x16x128xf32> to vector<256x128xf32>
    %c256 = arith.constant 256 : index
    %c0_9 = arith.constant 0 : index
    %21 = vector.load %arg3[%c256, %c0_9] : memref<1152x128xbf16, #tpu.memory_space<vmem>>, vector<128x128xbf16>
    %22 = arith.truncf %20 : vector<256x128xf32> to vector<256x128xbf16>
    %cst_10 = arith.constant dense<0.000000e+00> : vector<256x128xf32>
    %23 = tpu.matmul %22, %21, %cst_10 {dimension_numbers = #tpu.dot_dimension_numbers<[1], [0], [0], [1], [0, 0, 1, 1], [], []>} : vector<256x128xbf16>, vector<128x128xbf16>, vector<256x128xf32> -> vector<256x128xf32>
    %24 = arith.addf %18, %23 : vector<256x128xf32>
    %25 = vector.extract_strided_slice %5 {offsets = [1, 0, 0], sizes = [16, 16, 128], strides = [1, 1, 1]} : vector<18x18x128xf32> to vector<16x16x128xf32>
    %26 = vector.shape_cast %25 : vector<16x16x128xf32> to vector<256x128xf32>
    %c384 = arith.constant 384 : index
    %c0_11 = arith.constant 0 : index
    %27 = vector.load %arg3[%c384, %c0_11] : memref<1152x128xbf16, #tpu.memory_space<vmem>>, vector<128x128xbf16>
    %28 = arith.truncf %26 : vector<256x128xf32> to vector<256x128xbf16>
    %cst_12 = arith.constant dense<0.000000e+00> : vector<256x128xf32>
    %29 = tpu.matmul %28, %27, %cst_12 {dimension_numbers = #tpu.dot_dimension_numbers<[1], [0], [0], [1], [0, 0, 1, 1], [], []>} : vector<256x128xbf16>, vector<128x128xbf16>, vector<256x128xf32> -> vector<256x128xf32>
    %30 = arith.addf %24, %29 : vector<256x128xf32>
    %31 = vector.extract_strided_slice %5 {offsets = [1, 1, 0], sizes = [16, 16, 128], strides = [1, 1, 1]} : vector<18x18x128xf32> to vector<16x16x128xf32>
    %32 = vector.shape_cast %31 : vector<16x16x128xf32> to vector<256x128xf32>
    %c512 = arith.constant 512 : index
    %c0_13 = arith.constant 0 : index
    %33 = vector.load %arg3[%c512, %c0_13] : memref<1152x128xbf16, #tpu.memory_space<vmem>>, vector<128x128xbf16>
    %34 = arith.truncf %32 : vector<256x128xf32> to vector<256x128xbf16>
    %cst_14 = arith.constant dense<0.000000e+00> : vector<256x128xf32>
    %35 = tpu.matmul %34, %33, %cst_14 {dimension_numbers = #tpu.dot_dimension_numbers<[1], [0], [0], [1], [0, 0, 1, 1], [], []>} : vector<256x128xbf16>, vector<128x128xbf16>, vector<256x128xf32> -> vector<256x128xf32>
    %36 = arith.addf %30, %35 : vector<256x128xf32>
    %37 = vector.extract_strided_slice %5 {offsets = [1, 2, 0], sizes = [16, 16, 128], strides = [1, 1, 1]} : vector<18x18x128xf32> to vector<16x16x128xf32>
    %38 = vector.shape_cast %37 : vector<16x16x128xf32> to vector<256x128xf32>
    %c640 = arith.constant 640 : index
    %c0_15 = arith.constant 0 : index
    %39 = vector.load %arg3[%c640, %c0_15] : memref<1152x128xbf16, #tpu.memory_space<vmem>>, vector<128x128xbf16>
    %40 = arith.truncf %38 : vector<256x128xf32> to vector<256x128xbf16>
    %cst_16 = arith.constant dense<0.000000e+00> : vector<256x128xf32>
    %41 = tpu.matmul %40, %39, %cst_16 {dimension_numbers = #tpu.dot_dimension_numbers<[1], [0], [0], [1], [0, 0, 1, 1], [], []>} : vector<256x128xbf16>, vector<128x128xbf16>, vector<256x128xf32> -> vector<256x128xf32>
    %42 = arith.addf %36, %41 : vector<256x128xf32>
    %43 = vector.extract_strided_slice %5 {offsets = [2, 0, 0], sizes = [16, 16, 128], strides = [1, 1, 1]} : vector<18x18x128xf32> to vector<16x16x128xf32>
    %44 = vector.shape_cast %43 : vector<16x16x128xf32> to vector<256x128xf32>
    %c768 = arith.constant 768 : index
    %c0_17 = arith.constant 0 : index
    %45 = vector.load %arg3[%c768, %c0_17] : memref<1152x128xbf16, #tpu.memory_space<vmem>>, vector<128x128xbf16>
    %46 = arith.truncf %44 : vector<256x128xf32> to vector<256x128xbf16>
    %cst_18 = arith.constant dense<0.000000e+00> : vector<256x128xf32>
    %47 = tpu.matmul %46, %45, %cst_18 {dimension_numbers = #tpu.dot_dimension_numbers<[1], [0], [0], [1], [0, 0, 1, 1], [], []>} : vector<256x128xbf16>, vector<128x128xbf16>, vector<256x128xf32> -> vector<256x128xf32>
    %48 = arith.addf %42, %47 : vector<256x128xf32>
    %49 = vector.extract_strided_slice %5 {offsets = [2, 1, 0], sizes = [16, 16, 128], strides = [1, 1, 1]} : vector<18x18x128xf32> to vector<16x16x128xf32>
    %50 = vector.shape_cast %49 : vector<16x16x128xf32> to vector<256x128xf32>
    %c896 = arith.constant 896 : index
    %c0_19 = arith.constant 0 : index
    %51 = vector.load %arg3[%c896, %c0_19] : memref<1152x128xbf16, #tpu.memory_space<vmem>>, vector<128x128xbf16>
    %52 = arith.truncf %50 : vector<256x128xf32> to vector<256x128xbf16>
    %cst_20 = arith.constant dense<0.000000e+00> : vector<256x128xf32>
    %53 = tpu.matmul %52, %51, %cst_20 {dimension_numbers = #tpu.dot_dimension_numbers<[1], [0], [0], [1], [0, 0, 1, 1], [], []>} : vector<256x128xbf16>, vector<128x128xbf16>, vector<256x128xf32> -> vector<256x128xf32>
    %54 = arith.addf %48, %53 : vector<256x128xf32>
    %55 = vector.extract_strided_slice %5 {offsets = [2, 2, 0], sizes = [16, 16, 128], strides = [1, 1, 1]} : vector<18x18x128xf32> to vector<16x16x128xf32>
    %56 = vector.shape_cast %55 : vector<16x16x128xf32> to vector<256x128xf32>
    %c1024 = arith.constant 1024 : index
    %c0_21 = arith.constant 0 : index
    %57 = vector.load %arg3[%c1024, %c0_21] : memref<1152x128xbf16, #tpu.memory_space<vmem>>, vector<128x128xbf16>
    %58 = arith.truncf %56 : vector<256x128xf32> to vector<256x128xbf16>
    %cst_22 = arith.constant dense<0.000000e+00> : vector<256x128xf32>
    %59 = tpu.matmul %58, %57, %cst_22 {dimension_numbers = #tpu.dot_dimension_numbers<[1], [0], [0], [1], [0, 0, 1, 1], [], []>} : vector<256x128xbf16>, vector<128x128xbf16>, vector<256x128xf32> -> vector<256x128xf32>
    %60 = arith.addf %54, %59 : vector<256x128xf32>
    %c0_23 = arith.constant 0 : index
    %c0_24 = arith.constant 0 : index
    %61 = vector.load %arg4[%c0_23, %c0_24] : memref<1x128xf32, #tpu.memory_space<vmem>>, vector<1x128xf32>
    %62 = vector.broadcast %61 : vector<1x128xf32> to vector<256x128xf32>
    %63 = arith.addf %60, %62 : vector<256x128xf32>
    %c0_25 = arith.constant 0 : index
    %c0_26 = arith.constant 0 : index
    %c0_27 = arith.constant 0 : index
    %64 = vector.load %arg5[%c0_25, %c0_26, %c0_27] : memref<1x256x1xf32, #tpu.memory_space<vmem>>, vector<1x256x1xf32>
    %65 = vector.shape_cast %64 : vector<1x256x1xf32> to vector<256x1xf32>
    %66 = vector.broadcast %65 : vector<256x1xf32> to vector<256x128xf32>
    %67 = arith.mulf %63, %66 : vector<256x128xf32>
    %cst_28 = arith.constant dense<0.000000e+00> : vector<128xf32>
    %68 = vector.multi_reduction <add>, %67, %cst_28 [0] : vector<256x128xf32> to vector<128xf32>
    %69 = vector.shape_cast %68 : vector<128xf32> to vector<1x128xf32>
    %c0_29 = arith.constant 0 : index
    %c0_30 = arith.constant 0 : index
    %c0_31 = arith.constant 0 : index
    %70 = vector.load %arg6[%c0_29, %c0_30, %c0_31] : memref<1x1x128xf32, #tpu.memory_space<vmem>>, vector<1x1x128xf32>
    %71 = vector.shape_cast %69 : vector<1x128xf32> to vector<1x1x128xf32>
    %72 = arith.addf %70, %71 : vector<1x1x128xf32>
    %c0_32 = arith.constant 0 : index
    %c0_33 = arith.constant 0 : index
    %c0_34 = arith.constant 0 : index
    %73 = vector.load %arg6[%c0_32, %c0_33, %c0_34] : memref<1x1x128xf32, #tpu.memory_space<vmem>>, vector<1x1x128xf32>
    tpu.vector_store %arg6[%c0_32, %c0_33, %c0_34], %72 {strides = array<i32>} : memref<1x1x128xf32, #tpu.memory_space<vmem>>, vector<1x1x128xf32>,
    return
  }
  func.func @transform_0(%arg0: i32, %arg1: i32) -> (i32, i32, i32, i32) {
    %c2_i32 = arith.constant 2 : i32
    %0 = arith.muli %arg1, %c2_i32 : i32
    %1 = arith.addi %0, %arg0 : i32
    %c0_i32 = arith.constant 0 : i32
    %c0_i32_0 = arith.constant 0 : i32
    %c0_i32_1 = arith.constant 0 : i32
    %c0_i32_2 = arith.constant 0 : i32
    return %1, %c0_i32, %c0_i32_0, %c0_i32_1 : i32, i32, i32, i32
  }
  func.func @transform_1(%arg0: i32, %arg1: i32) -> (i32, i32) {
    %c0_i32 = arith.constant 0 : i32
    %c0_i32_0 = arith.constant 0 : i32
    %c0_i32_1 = arith.constant 0 : i32
    return %c0_i32, %c0_i32_0 : i32, i32
  }
  func.func @transform_2(%arg0: i32, %arg1: i32) -> (i32, i32) {
    %c0_i32 = arith.constant 0 : i32
    %c0_i32_0 = arith.constant 0 : i32
    %c0_i32_1 = arith.constant 0 : i32
    return %c0_i32, %c0_i32_0 : i32, i32
  }
  func.func @transform_3(%arg0: i32, %arg1: i32) -> (i32, i32, i32) {
    %c2_i32 = arith.constant 2 : i32
    %0 = arith.muli %arg1, %c2_i32 : i32
    %1 = arith.addi %0, %arg0 : i32
    %c0_i32 = arith.constant 0 : i32
    %c0_i32_0 = arith.constant 0 : i32
    %c0_i32_1 = arith.constant 0 : i32
    return %1, %c0_i32, %c0_i32_0 : i32, i32, i32
  }
  func.func @transform_4(%arg0: i32, %arg1: i32) -> (i32, i32, i32) {
    %c0_i32 = arith.constant 0 : i32
    %c0_i32_0 = arith.constant 0 : i32
    %c0_i32_1 = arith.constant 0 : i32
    return %arg0, %c0_i32, %c0_i32_0 : i32, i32, i32
  }
}

</mosaic_0001>

<bundles_post_ra>
// kernel: filter_initializer_forward.1
= control target key start
LH: loop header
LB: loop body
LE: loop exit
PB: predicated region body
PF: predicated region fallthrough
CT: control target
= control target key end

     0   :  { %9 = vsyncpa [#allocation3], 0  ;;  %s5887_s0 = inlined_call_operand.vmem [shape: bf16[4,18,18,128], index: 0, kind: input, shape index: {}]   ;;  %s5888_s1 = inlined_call_operand.vmem [shape: bf16[1152,128], index: 1, kind: input, shape index: {}]   ;;  %s5889_s2 = inlined_call_operand.vmem [shape: f32[1,128], index: 2, kind: input, shape index: {}]   ;;  %s5890_s3 = inlined_call_operand.vmem [shape: f32[4,256,1], index: 3, kind: input, shape index: {}]   ;;  %s5891_s4 = inlined_call_operand.hbm [shape: f32[2,1,128], index: 4, kind: output, shape index: {}]  }
   0x1   :  { %11 = vsyncpa [#allocation3 + $0x1], 0  ;;  %s4720_s15 = smov 0   ;;  %s4722_s16 = smov 0  }
   0x2   :  { %s4724_s17 = smov 0   ;;  %s4726_s18 = smov 0  }
   0x3   :  { %s4728_s19 = smov 0   ;;  %s4730_s20 = smov 0  }
   0x4   :  { %s4732_s21 = smov 0   ;;  %s4734_s22 = smov 0  }
   0x5 LB: > { %s3374_s23 = sadd.s32 4294967295, %s4690_s22   ;;  %s3375_s24 = sadd.s32 4294967294, %s4690_s22   ;;  %s4690_s22 = sphi %s4734_s22, %s17_s22   ;;  %s4686_s21 = sphi %s4732_s21, %s5975_s21   ;;  %s4682_s20 = sphi %s4730_s20, %s5974_s20   ;;  %s4678_s19 = sphi %s4728_s19, %s5973_s19   ;;  %s4674_s18 = sphi %s4726_s18, %s5972_s18   ;;  %s4670_s17 = sphi %s4724_s17, %s5971_s17   ;;  %s4666_s16 = sphi %s4722_s16, %s5970_s16   ;;  %s4662_s15 = sphi %s4720_s15, %s5969_s15  }
   0x6   : > { %s26_s25 = sadd.s32 1, %s4682_s20  ;;  %s29_s26 = sadd.s32 1, %s4686_s21 }
   0x7   : > { %p27_p0 = scmp.ge.s32.totalorder %s26_s25, 2  ;;  %p148_p1 = scmp.ne.s32.totalorder %s4670_s17, %s4666_s16 }
   0x8   : > { %p149_p2 = scmp.eq.s32.totalorder %s3374_s23, 3  ;;  %p154_p4 = scmp.ne.s32.totalorder %s4666_s16, %s4662_s15 }
   0x9   : > { %s5977_s25 = smov (%p27_p0, %s26_s25), 0  ;;  %s5979_s26 = smov (!%p27_p0, %s29_s26), %s4686_s21 }
   0xa   : > { %p4769_p3 = por %p149_p2, %p148_p1  ;;  %p31_p5 = scmp.ge.s32.totalorder %s5979_s26, 2 }
   0xb   : > { %p155_p6 = scmp.eq.s32.totalorder %s3375_s24, 3  ;;  %p3382_p7 = scmp.ge.s32.totalorder %s4690_s22, 1 }
   0xc   : > { %p203_p8 = scmp.lt.s32.totalorder %s4690_s22, 5  ;;  %s5981_s26 = smov (%p31_p5, %s5979_s26), 0 }
   0xd   : > { %p4779_p9 = por %p155_p6, %p154_p4  ;;  %s135_s29 = ssub.s32 %s4686_s21, %s5981_s26 }
   0xe   : > { %p204_p10 = pnand %p3382_p7, %p203_p8  ;;  %s138_s30 = sadd.s32 1, %s4670_s17 }
   0xf   : > { %p136_p11 = scmp.eq.s32.totalorder %s135_s29, 0 }
  0x10   : > { %207 = sbr.rel (%p204_p10) target bundleno = 603 (0x25b), region = 36 }
  0x11   : > { %s4787_s5 = scalar_select %p136_p11, %s4670_s17, %s138_s30  }
  0x17   : > { %s235_s6 = sand.u32 1, %s4666_s16   ;;  %s3383_s7 = sshll.u32 %s4674_s18, 1 }
  0x18   : > { %s238_s8 = sadd.s32 %s4678_s19, %s3383_s7  ;;  %s4804_s29 = scalar_lea.vmem [#allocation2], %s235_s6 }
  0x19   : > { %p239_p12 = scmp.lt.s32.totalorder %s238_s8, 3  ;;  %p3388_p13 = scmp.ne.s32.totalorder %s4674_s18, 0 }
  0x1a   : > { %v4692_v0 = vmov (!%p3388_p13), 0.0  }
  0x1b   : > { %s5983_s8 = smov (!%p239_p12, %s238_s8), 3  ;;  %259 = sbr.rel (%p3388_p13) target bundleno = 34 (0x22), region = 40 }
  0x1c   : > { %s4404_s9 = smul.u32 216, %s5983_s8  ;;  %s3483_s10 = sshll.u32 %s5983_s8, 8  ;;  %260 = vst [vmem:[%s4804_s29] sm:$0x1] (!%p3388_p13), %v4692_v0 }
  0x1d   : > { %s4795_s13 = scalar_lea.vmem %s5890_s3, %s3483_s10 }
  0x1e   : > { %s4800_s24 = scalar_lea.vmem %s5887_s0, %s4404_s9 }
  0x22 PF: > { %v4480_v1 = vld [vmem:[%s5888_s1 + $0x40] sm:$0xff]   ;;  %v4482_v3 = vld [vmem:[%s5888_s1 + $0x48] sm:$0xff]   ;;  %v4484_v5 = vld [vmem:[%s5888_s1 + $0x50] sm:$0xff]   ;;  %vm449_vm0 = vcmask 1046528   ;;  %vm1012_vm1 = vcmask 1045504   ;;  %s3480_s18 = sshll.u32 %s4678_s19, 4 }
  0x23   : > { %v4481_v2 = vld [vmem:[%s5888_s1 + $0x100] sm:$0xff]   ;;  %3700 = vmatprep.subr.bf16.mxu1 %v4480_v1  ;;  %v4483_v4 = vld [vmem:[%s5888_s1 + $0x108] sm:$0xff]   ;;  %v4485_v6 = vld [vmem:[%s5888_s1 + $0x110] sm:$0xff]   ;;  %s3296_s12 = sshll.u32 %s4804_s29, 4  ;;  %s5831_s30 = scalar_lea.hbm %s5891_s4, %s3480_s18  ;;  %s5833_s12 = int_to_ptr.vmem [resolvable:$true] %s3296_s12 }
  0x24   : > { %3892 = vmatprep.subr.bf16.mxu0 %v4481_v2  ;;  %3701 = vmatpush3.bf16.msra.mxu1 %v4480_v1  ;;  %v4486_v7 = vld [vmem:[%s5888_s1 + $0x58] sm:$0xff]   ;;  %v4488_v9 = vld [vmem:[%s5888_s1 + $0x60] sm:$0xff]   ;;  %v4490_v11 = vld [vmem:[%s5888_s1 + $0x68] sm:$0xff]   ;;  %s3284_s7 = scalar_lea.sflag [#allocation3], %s235_s6  ;;  %s4596_s8 = scalar_lea.vmem %s5833_s12, 16 }
  0x25   : > { %3893 = vmatpush3.bf16.msra.mxu0 %v4481_v2  ;;  %3702 = vmatprep.subr.bf16.mxu1 %v4482_v3  ;;  %v4487_v8 = vld [vmem:[%s5888_s1 + $0x118] sm:$0xff]   ;;  %v4489_v10 = vld [vmem:[%s5888_s1 + $0x120] sm:$0xff]   ;;  %v4491_v12 = vld [vmem:[%s5888_s1 + $0x128] sm:$0xff]   ;;  %p4597_p0 = scmp.ne.s32.totalorder %s5833_s12, %s4596_s8  ;;  %s4694_s19 = smov [#allocation2]  }
  0x26   : > { %3894 = vmatprep.subr.bf16.mxu0 %v4483_v4  ;;  %v4845_v13 = vld [vmem:[%s4800_s24] sm:$0xff]   ;;  %v4848_v14 = vld [vmem:[%s4800_s24 + $0x8] sm:$0x1]  ;;  %v4851_v15 = vld [vmem:[%s4800_s24 + $0xc] sm:$0xff]   ;;  %s4600_s10 = sshll.u32 %s4694_s19, 4  ;;  %s4601_s10 = int_to_ptr.vmem [resolvable:$false] %s4600_s10 }
  0x27   : > { %v5894_v16 = vunpack.c.l.bf16 %v4845_v13  ;;  %v5893_v17 = vunpack.c.h.bf16 %v4845_v13  ;;  %v5892_v18 = vunpack.c.l.bf16 %v4848_v14  ;;  %v4857_v19 = vld [vmem:[%s4800_s24 + $0x14] sm:$0x1]  ;;  %v318_v20 = vunpack.c.l.bf16 %v4851_v15  ;;  %v4863_v23 = vld [vmem:[%s4800_s24 + $0x18] sm:$0xff]   ;;  %v4866_v24 = vld [vmem:[%s4800_s24 + $0x20] sm:$0x1]  ;;  %p4598_p1 = pnand %p4597_p0, %p4769_p3  ;;  %p4603_p4 = scmp.lt.s32.totalorder %s5833_s12, %s4601_s10 }
  0x28   : > { %3703 = vmatpush3.bf16.msra.mxu1 %v4482_v3  ;;  %v319_v21 = vunpack.c.h.bf16 %v4851_v15  ;;  %v320_v22 = vunpack.c.l.bf16 %v4857_v19  ;;  %v4492_v29 = vld [vmem:[%s5888_s1 + $0x70] sm:$0xff]   ;;  %v321_v33 = vunpack.c.l.bf16 %v4863_v23  ;;  %v322_v34 = vunpack.c.h.bf16 %v4863_v23  ;;  %v4892_v38 = vld [vmem:[%s4800_s24 + $0x24] sm:$0xff]   ;;  %v4897_v42 = vld [vmem:[%s4800_s24 + $0x2c] sm:$0x1] }
  0x29   : > { %3895 = vmatpush3.bf16.msra.mxu0 %v4483_v4  ;;  %3704 = vmatprep.subr.bf16.mxu1 %v4484_v5  ;;  %v450_v25 = vrot.slane %v5894_v16, 1  ;;  %v451_v26 = vrot.slane %v5893_v17, 1  ;;  %v453_v27 = vrot.slane %v5892_v18, 1  ;;  %v455_v28 = vrot.slane %v318_v20, 1  ;;  %v4493_v30 = vld [vmem:[%s5888_s1 + $0x130] sm:$0xff]   ;;  %v4494_v43 = vld [vmem:[%s5888_s1 + $0x78] sm:$0xff]   ;;  %p4599_p2 = pneg %p4598_p1 }
  0x2a   : > { %3896 = vmatprep.subr.bf16.mxu0 %v4485_v6  ;;  %v456_v31 = vrot.slane %v319_v21, 1  ;;  %v458_v32 = vrot.slane %v320_v22, 1  ;;  %v323_v37 = vunpack.c.l.bf16 %v4866_v24  ;;  %v460_v45 = vrot.slane %v321_v33, 1  ;;  %v4905_v46 = vld [vmem:[%s4800_s24 + $0x30] sm:$0xff]   ;;  %v4914_v51 = vld [vmem:[%s4800_s24 + $0x38] sm:$0x1] }
  0x2b   : > { %v452_v35 = vsel %vm449_vm0, %v450_v25, %v451_v26  ;;  %v454_v36 = vsel %vm449_vm0, %v451_v26, %v453_v27  ;;  %v461_v47 = vrot.slane %v322_v34, 1  ;;  %v324_v49 = vunpack.c.l.bf16 %v4892_v38  ;;  %v4495_v52 = vld [vmem:[%s5888_s1 + $0x138] sm:$0xff]   ;;  %v4933_v61 = vld [vmem:[%s4800_s24 + $0x44] sm:$0x1]  ;;  %v4499_v25 = vld [vmem:[%s5888_s1 + $0x148] sm:$0xff]  }
  0x2c   : > { %3705 = vmatpush3.bf16.msra.mxu1 %v4484_v5  ;;  %v578_v39 = vpack.c.bf16 %v454_v36, %v452_v35  ;;  %v457_v40 = vsel %vm449_vm0, %v455_v28, %v456_v31  ;;  %v459_v41 = vsel %vm449_vm0, %v456_v31, %v458_v32  ;;  %v463_v48 = vrot.slane %v323_v37, 1  ;;  %v4927_v58 = vld [vmem:[%s4800_s24 + $0x3c] sm:$0xff]   ;;  %v4500_v27 = vld [vmem:[%s5888_s1 + $0x8] sm:$0xff]   ;;  %v4977_v31 = vld [vmem:[%s4800_s24 + $0x54] sm:$0xff]  }
  0x2d   : > { %3897 = vmatpush3.bf16.msra.mxu0 %v4485_v6  ;;  %3706 = vmatprep.subr.bf16.mxu1 %v4486_v7  ;;  %v579_v44 = vpack.c.bf16 %v459_v41, %v457_v40  ;;  %v325_v50 = vunpack.c.h.bf16 %v4892_v38  ;;  %v326_v53 = vunpack.c.l.bf16 %v4897_v42  ;;  %v465_v54 = vrot.slane %v324_v49, 1  ;;  %v4497_v62 = vld [vmem:[%s5888_s1] sm:$0xff]   ;;  %v4980_v32 = vld [vmem:[%s4800_s24 + $0x5c] sm:$0x1]  ;;  %v5047_v18 = vld [vmem:[%s4800_s24 + $0x74] sm:$0x1] }
  0x2e   : > { %3898 = vmatprep.subr.bf16.mxu0 %v4487_v8  ;;  %3716 = vmatprep.mubr.bf16.mxu1 %v578_v39  ;;  %v327_v56 = vunpack.c.l.bf16 %v4905_v46  ;;  %v328_v57 = vunpack.c.h.bf16 %v4905_v46  ;;  %v329_v60 = vunpack.c.l.bf16 %v4914_v51  ;;  %v462_v63 = vsel %vm449_vm0, %v460_v45, %v461_v47  ;;  %v4498_v1 = vld [vmem:[%s5888_s1 + $0x140] sm:$0xff]   ;;  %v4501_v45 = vld [vmem:[%s5888_s1 + $0x150] sm:$0xff]   ;;  %v5147_v42 = vld [vmem:[%s4800_s24 + $0x98] sm:$0x1] }
  0x2f   : > { %3908 = vmatprep.mubr.bf16.mxu0 %v579_v44  ;;  %v466_v55 = vrot.slane %v325_v50, 1  ;;  %v468_v59 = vrot.slane %v326_v53, 1  ;;  %v464_v0 = vsel %vm449_vm0, %v461_v47, %v463_v48  ;;  %v330_v2 = vunpack.c.l.bf16 %v4927_v58 }
  0x30   : > { %3707 = vmatpush3.bf16.msra.mxu1 %v4486_v7  ;;  %v331_v3 = vunpack.c.h.bf16 %v4927_v58  ;;  %v332_v4 = vunpack.c.l.bf16 %v4933_v61  ;;  %v470_v7 = vrot.slane %v327_v56, 1  ;;  %v1024_v19 = vrot.slane %v322_v34, 2 }
  0x31   : > { %3899 = vmatpush3.bf16.msra.mxu0 %v4487_v8  ;;  %3708 = vmatprep.subr.bf16.mxu1 %v4488_v9  ;;  %v467_v5 = vsel %vm449_vm0, %v465_v54, %v466_v55  ;;  %v469_v6 = vsel %vm449_vm0, %v466_v55, %v468_v59  ;;  %v471_v8 = vrot.slane %v328_v57, 1  ;;  %v475_v28 = vrot.slane %v330_v2, 1 }
  0x32   : > { %3900 = vmatprep.subr.bf16.mxu0 %v4489_v10  ;;  %v4965_v26 = vpack.c.bf16 %v469_v6, %v467_v5  ;;  %v5898_v54 = vunpack.c.l.bf16 %v4980_v32 }
  0x33   : > { %v472_v40 = vsel %vm449_vm0, %v470_v7, %v471_v8  ;;  %v5020_v7 = vld [vmem:[%s4800_s24 + $0x68] sm:$0x1] }
  0x34   : > { %3709 = vmatpush3.bf16.msra.mxu1 %v4488_v9  ;;  %v4952_v9 = vpack.c.bf16 %v464_v0, %v462_v63  ;;  %v5010_v0 = vld [vmem:[%s4800_s24 + $0x60] sm:$0xff]  }
  0x35   : > { %3901 = vmatpush3.bf16.msra.mxu0 %v4489_v10  ;;  %3710 = vmatprep.subr.bf16.mxu1 %v4490_v11  ;;  %v473_v10 = vrot.slane %v329_v60, 1 }
  0x36   : > { %3902 = vmatprep.subr.bf16.mxu0 %v4491_v12 }
  0x37   : > { %v474_v41 = vsel %vm449_vm0, %v471_v8, %v473_v10  ;;  %v488_v10 = vrot.slane %v5898_v54, 1 }
  0x38   : > { %3711 = vmatpush3.bf16.msra.mxu1 %v4490_v11  ;;  %v4957_v11 = vld [vmem:[%s4800_s24 + $0x48] sm:$0xff]   ;;  %v5001_v55 = vpack.c.bf16 %v474_v41, %v472_v40  ;;  %v4504_v40 = vld [vmem:[%s5888_s1 + $0x160] sm:$0xff]   ;;  %v5897_v41 = vunpack.c.l.bf16 %v5020_v7 }
  0x39   : > { %3903 = vmatpush3.bf16.msra.mxu0 %v4491_v12  ;;  %3712 = vmatprep.subr.bf16.mxu1 %v4492_v29  ;;  %v4960_v12 = vld [vmem:[%s4800_s24 + $0x50] sm:$0x1]  ;;  %v5910_v35 = vunpack.c.l.bf16 %v4957_v11  ;;  %v5907_v36 = vunpack.c.h.bf16 %v4957_v11 }
  0x3a   : > { %3904 = vmatprep.subr.bf16.mxu0 %v4493_v30  ;;  %v5901_v39 = vunpack.c.l.bf16 %v4960_v12 }
  0x3b   : > { %v480_v59 = vrot.slane %v5910_v35, 1 }
  0x3c   : > { %3713 = vmatpush3.bf16.msra.mxu1 %v4492_v29  ;;  %v476_v29 = vrot.slane %v331_v3, 1  ;;  %v483_v63 = vrot.slane %v5901_v39, 1  ;;  %v5113_v39 = vld [vmem:[%s4800_s24 + $0x8c] sm:$0x1] }
  0x3d   : > { %3905 = vmatpush3.bf16.msra.mxu0 %v4493_v30  ;;  %3714 = vmatprep.subr.bf16.mxu1 %v4494_v43  ;;  %v478_v30 = vrot.slane %v332_v4, 1 }
  0x3e   : > { %3906 = vmatprep.subr.bf16.mxu0 %v4495_v52  ;;  %v477_v47 = vsel %vm449_vm0, %v475_v28, %v476_v29  ;;  %v5895_v28 = vunpack.c.h.bf16 %v5010_v0 }
  0x3f   : > { %v479_v48 = vsel %vm449_vm0, %v476_v29, %v478_v30 }
  0x40   : > { %3715 = vmatpush3.bf16.msra.mxu1 %v4494_v43  ;;  %v4503_v43 = vld [vmem:[%s5888_s1 + $0x10] sm:$0xff]   ;;  %v5015_v5 = vpack.c.bf16 %v479_v48, %v477_v47  ;;  %v1018_v47 = vrot.slane %v318_v20, 2  ;;  %v491_v16 = vrot.slane %v5895_v28, 1 }
  0x41   : > { %3907 = vmatpush3.bf16.msra.mxu0 %v4495_v52  ;;  %3748 = vmatprep.subr.bf16.mxu1 %v4497_v62  ;;  %v5899_v52 = vunpack.c.h.bf16 %v4977_v31  ;;  %v5044_v48 = vld [vmem:[%s4800_s24 + $0x6c] sm:$0xff]  }
  0x42   : > { %3940 = vmatprep.subr.bf16.mxu0 %v4498_v1  ;;  %v5906_v28 = vunpack.c.h.bf16 %v5044_v48 }
  0x43   : > { %3717 = vmatmul.mubr.bf16.vlgmr.msra.gmra.mrb[0].mxu1 %v579_v44  ;;  %v5900_v44 = vunpack.c.l.bf16 %v4977_v31  ;;  %v486_v8 = vrot.slane %v5899_v52, 1 }
  0x44   : > { %3909 = vmatmul.mubr.bf16.vlgmr.msra.gmra.mrb[0].mxu0 %v4952_v9  ;;  %3749 = vmatpush3.bf16.msra.mxu1 %v4497_v62  ;;  %v481_v62 = vrot.slane %v5907_v36, 1 }
  0x45   : > { %3941 = vmatpush3.bf16.msra.mxu0 %v4498_v1  ;;  %3720 = vmatprep.mubr.bf16.mxu1 %v4952_v9  ;;  %v4502_v1 = vld [vmem:[%s5888_s1 + $0x158] sm:$0xff]   ;;  %v485_v6 = vrot.slane %v5900_v44, 1  ;;  %v5110_v44 = vld [vmem:[%s4800_s24 + $0x84] sm:$0xff]  }
  0x46   : > { %3942 = vmatprep.subr.bf16.mxu0 %v4499_v25  ;;  %3912 = vmatprep.mubr.bf16.mxu0 %v4965_v26  ;;  %v482_v29 = vsel %vm449_vm0, %v480_v59, %v481_v62  ;;  %v484_v30 = vsel %vm449_vm0, %v481_v62, %v483_v63  ;;  %v5050_v59 = vld [vmem:[%s4800_s24 + $0x78] sm:$0xff]   ;;  %v489_v63 = vsel %vm449_vm0, %v486_v8, %v488_v10  ;;  %v5902_v10 = vunpack.c.l.bf16 %v5044_v48 }
  0x47   : > { %3750 = vmatprep.subr.bf16.mxu1 %v4500_v27  ;;  %v487_v62 = vsel %vm449_vm0, %v485_v6, %v486_v8  ;;  %v5056_v17 = vpack.c.bf16 %v484_v30, %v482_v29  ;;  %v493_v6 = vrot.slane %v5897_v41, 1  ;;  %v1019_v8 = vrot.slane %v319_v21, 2  ;;  %v4505_v29 = vld [vmem:[%s5888_s1 + $0x168] sm:$0xff]   ;;  %v5080_v41 = vld [vmem:[%s4800_s24 + $0x80] sm:$0x1] }
  0x48   : > { %3751 = vmatpush3.bf16.msra.mxu1 %v4500_v27  ;;  %v5896_v27 = vunpack.c.l.bf16 %v5010_v0  ;;  %v5075_v30 = vpack.c.bf16 %v489_v63, %v487_v62  ;;  %v5903_v21 = vunpack.c.l.bf16 %v5050_v59  ;;  %v1026_v62 = vrot.slane %v323_v37, 2 }
  0x49   : > { %3943 = vmatpush3.bf16.msra.mxu0 %v4499_v25  ;;  %3752 = vmatprep.subr.bf16.mxu1 %v4503_v43  ;;  %v4506_v25 = vld [vmem:[%s5888_s1 + $0x18] sm:$0xff]   ;;  %v495_v63 = vrot.slane %v5902_v10, 1  ;;  %v5908_v54 = vunpack.c.l.bf16 %v5080_v41  ;;  %v494_v24 = vsel %vm449_vm0, %v491_v16, %v493_v6  ;;  %v496_v37 = vrot.slane %v5906_v28, 1  ;;  %v5140_v28 = vld [vmem:[%s4800_s24 + $0x90] sm:$0xff]  }
  0x4a   : > { %3944 = vmatprep.subr.bf16.mxu0 %v4501_v45  ;;  %v490_v20 = vrot.slane %v5896_v27, 1  ;;  %v5904_v27 = vunpack.c.l.bf16 %v5047_v18  ;;  %v500_v52 = vrot.slane %v5903_v21, 1  ;;  %v1029_v6 = vrot.slane %v325_v50, 2 }
  0x4b   : > { %3721 = vmatmul.mubr.bf16.gmra.mrb[4].mxu1 %v4965_v26  ;;  %v1031_v50 = vrot.slane %v326_v53, 2  ;;  %v5915_v36 = vunpack.c.h.bf16 %v5110_v44 }
  0x4c   : > { %3913 = vmatmul.mubr.bf16.gmra.mrb[4].mxu0 %v5001_v55  ;;  %3724 = vmatprep.mubr.bf16.mxu1 %v5001_v55  ;;  %v492_v34 = vsel %vm449_vm0, %v490_v20, %v491_v16  ;;  %v498_v20 = vrot.slane %v5904_v27, 1  ;;  %v1028_v16 = vrot.slane %v324_v49, 2  ;;  %v4513_v27 = vld [vmem:[%s5888_s1 + $0x30] sm:$0xff]   ;;  %v503_v49 = vrot.slane %v5908_v54, 1 }
  0x4d   : > { %3945 = vmatpush3.bf16.msra.mxu0 %v4501_v45  ;;  %3916 = vmatprep.mubr.bf16.mxu0 %v5015_v5  ;;  %v1023_v45 = vrot.slane %v321_v33, 2  ;;  %v1021_v33 = vrot.slane %v320_v22, 2  ;;  %v5905_v22 = vunpack.c.h.bf16 %v5050_v59  ;;  %v5914_v54 = vunpack.c.l.bf16 %v5113_v39 }
  0x4e   : > { %3946 = vmatprep.subr.bf16.mxu0 %v4502_v1  ;;  %3753 = vmatpush3.bf16.msra.mxu1 %v4503_v43  ;;  %v4509_v43 = vld [vmem:[%s5888_s1 + $0x20] sm:$0xff]   ;;  %v499_v53 = vsel %vm449_vm0, %v496_v37, %v498_v20 }
  0x4f   : > { %3754 = vmatprep.subr.bf16.mxu1 %v4506_v25  ;;  %v1022_v10 = vsel %vm1012_vm1, %v1019_v8, %v1021_v33  ;;  %v501_v21 = vrot.slane %v5905_v22, 1  ;;  %v1025_v33 = vsel %vm1012_vm1, %v1023_v45, %v1024_v19  ;;  %v5909_v22 = vunpack.c.l.bf16 %v5110_v44 }
  0x51   : > { %3947 = vmatpush3.bf16.msra.mxu0 %v4502_v1  ;;  %v4511_v1 = vld [vmem:[%s5888_s1 + $0x28] sm:$0xff]   ;;  %v502_v45 = vsel %vm449_vm0, %v500_v52, %v501_v21  ;;  %v1032_v52 = vsel %vm1012_vm1, %v1029_v6, %v1031_v50  ;;  %v505_v20 = vrot.slane %v5909_v22, 1 }
  0x52   : > { %3948 = vmatprep.subr.bf16.mxu0 %v4504_v40  ;;  %3755 = vmatpush3.bf16.msra.mxu1 %v4506_v25  ;;  %v4507_v25 = vld [vmem:[%s5888_s1 + $0x170] sm:$0xff]   ;;  %v5184_v50 = vld [vmem:[%s4800_s24 + $0xa8] sm:$0xff]  }
  0x53   : > { %3725 = vmatmul.mubr.bf16.gmra.mrb[8].mxu1 %v5015_v5  ;;  %3756 = vmatprep.subr.bf16.mxu1 %v4509_v43 }
  0x54   : > { %3917 = vmatmul.mubr.bf16.gmra.mrb[8].mxu0 %v5056_v17  ;;  %3728 = vmatprep.mubr.bf16.mxu1 %v5056_v17 }
  0x55   : > { %3949 = vmatpush3.bf16.msra.mxu0 %v4504_v40  ;;  %3920 = vmatprep.mubr.bf16.mxu0 %v5075_v30  ;;  %v1020_v40 = vsel %vm1012_vm1, %v1018_v47, %v1019_v8  ;;  %v5126_v47 = vpack.c.bf16 %v494_v24, %v492_v34  ;;  %v497_v34 = vsel %vm449_vm0, %v495_v63, %v496_v37  ;;  %v5912_v63 = vunpack.c.h.bf16 %v5140_v28  ;;  %v5166_v37 = vld [vmem:[%s4800_s24 + $0xa4] sm:$0x1] }
  0x56   : > { %3950 = vmatprep.subr.bf16.mxu0 %v4505_v29  ;;  %3757 = vmatpush3.bf16.msra.mxu1 %v4509_v43  ;;  %v4508_v43 = vld [vmem:[%s5888_s1 + $0x178] sm:$0xff]   ;;  %v5135_v8 = vpack.c.bf16 %v1022_v10, %v1020_v40  ;;  %v1027_v24 = vsel %vm1012_vm1, %v1024_v19, %v1026_v62  ;;  %v1030_v10 = vsel %vm1012_vm1, %v1028_v16, %v1029_v6  ;;  %v4510_v19 = vld [vmem:[%s5888_s1 + $0x180] sm:$0xff]   ;;  %v5913_v62 = vunpack.c.l.bf16 %v5140_v28 }
  0x57   : > { %3758 = vmatprep.subr.bf16.mxu1 %v4511_v1  ;;  %5929 = vst [vmem:[#allocation5_spill] sm:$0xff] %v5126_v47  ;;  %v5911_v40 = vunpack.c.l.bf16 %v5147_v42  ;;  %v5173_v16 = vld [vmem:[%s4800_s24 + $0x9c] sm:$0xff]   ;;  %v5177_v6 = vpack.c.bf16 %v1027_v24, %v1025_v33  ;;  %v5188_v35 = vpack.c.bf16 %v1032_v52, %v1030_v10  ;;  %v1034_v33 = vrot.slane %v328_v57, 2 }
  0x58   : > { %v1036_v24 = vrot.slane %v329_v60, 2  ;;  %v5916_v51 = vunpack.c.l.bf16 %v5173_v16  ;;  %v5917_v60 = vunpack.c.h.bf16 %v5173_v16  ;;  %v5918_v10 = vunpack.c.l.bf16 %v5166_v37  ;;  %v5216_v52 = vld [vmem:[%s5888_s1 + $0x80] sm:$0xff]  }
  0x59   : > { %3951 = vmatpush3.bf16.msra.mxu0 %v4505_v29  ;;  %v4515_v29 = vld [vmem:[%s5888_s1 + $0x38] sm:$0xff]   ;;  %v513_v57 = vrot.slane %v5911_v40, 1 }
  0x5a   : > { %3952 = vmatprep.subr.bf16.mxu0 %v4507_v25  ;;  %3759 = vmatpush3.bf16.msra.mxu1 %v4511_v1  ;;  %v504_v1 = vsel %vm449_vm0, %v501_v21, %v503_v49  ;;  %v5175_v21 = vpack.c.bf16 %v499_v53, %v497_v34  ;;  %v506_v49 = vrot.slane %v5915_v36, 1  ;;  %v1033_v34 = vrot.slane %v327_v56, 2 }
  0x5b   : > { %3729 = vmatmul.mubr.bf16.gmra.mrb[12].mxu1 %v5075_v30  ;;  %3760 = vmatprep.subr.bf16.mxu1 %v4513_v27  ;;  %v5186_v22 = vpack.c.bf16 %v504_v1, %v502_v45  ;;  %v510_v53 = vrot.slane %v5913_v62, 1  ;;  %v511_v45 = vrot.slane %v5912_v63, 1  ;;  %v1038_v56 = vrot.slane %v330_v2, 2  ;;  %v5211_v1 = vld [vmem:[%s4800_s24 + $0xb0] sm:$0x1] }
  0x5c   : > { %3921 = vmatmul.mubr.bf16.gmra.mrb[12].mxu0 %v5126_v47  ;;  %3732 = vmatprep.mubr.bf16.mxu1 %v5126_v47  ;;  %5930 = vst [vmem:[#allocation6_spill] sm:$0xff] %v5175_v21  ;;  %v1039_v2 = vrot.slane %v331_v3, 2  ;;  %v507_v40 = vsel %vm449_vm0, %v505_v20, %v506_v49  ;;  %v1035_v62 = vsel %vm1012_vm1, %v1033_v34, %v1034_v33  ;;  %v516_v34 = vrot.slane %v5917_v60, 1 }
  0x5d   : > { %3953 = vmatpush3.bf16.msra.mxu0 %v4507_v25  ;;  %3956 = vmatprep.mubr.bf16.mxu0 %v5135_v8  ;;  %v508_v25 = vrot.slane %v5914_v54, 1  ;;  %5931 = vst [vmem:[#allocation7_spill] sm:$0xff] %v5186_v22  ;;  %v357_v54 = vunpack.c.l.bf16 %v5184_v50  ;;  %v1037_v3 = vsel %vm1012_vm1, %v1034_v33, %v1036_v24  ;;  %v512_v61 = vsel %vm449_vm0, %v510_v53, %v511_v45  ;;  %v5245_v24 = vld [vmem:[%s4800_s24 + $0xb4] sm:$0xff]  }
  0x5e   : > { %3954 = vmatprep.subr.bf16.mxu0 %v4508_v43  ;;  %3761 = vmatpush3.bf16.msra.mxu1 %v4513_v27  ;;  %v4512_v27 = vld [vmem:[%s5888_s1 + $0x188] sm:$0xff]   ;;  %v518_v33 = vrot.slane %v5918_v10, 1  ;;  %v1040_v53 = vsel %vm1012_vm1, %v1038_v56, %v1039_v2  ;;  %v5932_v36 = vunpack.c.l.bf16 %v4957_v11  ;;  %v5934_v10 = vunpack.c.l.bf16 %v4960_v12 }
  0x5f   : > { %3762 = vmatprep.subr.bf16.mxu1 %v4515_v29  ;;  %v509_v63 = vsel %vm449_vm0, %v506_v49, %v508_v25  ;;  %v514_v49 = vsel %vm449_vm0, %v511_v45, %v513_v57  ;;  %v515_v25 = vrot.slane %v5916_v51, 1  ;;  %v5933_v45 = vunpack.c.h.bf16 %v4957_v11  ;;  %v5254_v51 = vld [vmem:[%s4800_s24 + $0xbc] sm:$0x1] }
  0x60   : > { %v1043_v20 = vrot.slane %v5932_v36, 2  ;;  %v5257_v60 = vpack.c.bf16 %v509_v63, %v507_v40  ;;  %v520_v56 = vrot.slane %v357_v54, 1  ;;  %v5935_v36 = vunpack.c.h.bf16 %v5184_v50 }
  0x61   : > { %3955 = vmatpush3.bf16.msra.mxu0 %v4508_v43  ;;  %v1041_v43 = vrot.slane %v332_v4, 2  ;;  %v4514_v4 = vld [vmem:[%s5888_s1 + $0x190] sm:$0xff]   ;;  %v1044_v57 = vrot.slane %v5933_v45, 2  ;;  %v5936_v45 = vunpack.c.l.bf16 %v5211_v1  ;;  %v517_v63 = vsel %vm449_vm0, %v515_v25, %v516_v34 }
  0x62   : > { %3988 = vmatprep.subr.bf16.mxu0 %v4510_v19  ;;  %3763 = vmatpush3.bf16.msra.mxu1 %v4515_v29  ;;  %v1046_v29 = vrot.slane %v5934_v10, 2  ;;  %v519_v12 = vsel %vm449_vm0, %v516_v34, %v518_v33  ;;  %v5937_v40 = vunpack.c.l.bf16 %v4977_v31  ;;  %v5938_v10 = vunpack.c.h.bf16 %v4977_v31 }
  0x63   : > { %3733 = vmatmul.mubr.bf16.gmra.mrb[16].mxu1 %v5175_v21  ;;  %3796 = vmatprep.subr.bf16.mxu1 %v5216_v52  ;;  %v523_v21 = vrot.slane %v5936_v45, 1  ;;  %v1045_v25 = vsel %vm1012_vm1, %v1043_v20, %v1044_v57  ;;  %v5924_v34 = vunpack.c.h.bf16 %v5245_v24  ;;  %v5925_v33 = vunpack.c.l.bf16 %v5254_v51  ;;  %v4519_v20 = vld [vmem:[%s5888_s1 + $0x1a0] sm:$0xff]  }
  0x64   : > { %3957 = vmatmul.mubr.bf16.vlgmr.msra.gmra.mrb[0].mxu0 %v5177_v6  ;;  %3736 = vmatprep.mubr.bf16.mxu1 %v5186_v22  ;;  %v5263_v22 = vpack.c.bf16 %v1037_v3, %v1035_v62  ;;  %v1048_v62 = vrot.slane %v5937_v40, 2  ;;  %v1049_v3 = vrot.slane %v5938_v10, 2  ;;  %v5295_v45 = vpack.c.bf16 %v519_v12, %v517_v63 }
  0x65   : > { %3989 = vmatpush3.bf16.msra.mxu0 %v4510_v19  ;;  %3960 = vmatprep.mubr.bf16.mxu0 %v5188_v35  ;;  %v1042_v19 = vsel %vm1012_vm1, %v1039_v2, %v1041_v43  ;;  %v5265_v2 = vpack.c.bf16 %v514_v49, %v512_v61  ;;  %v521_v43 = vrot.slane %v5935_v36, 1  ;;  %v5939_v61 = vunpack.c.l.bf16 %v4980_v32 }
  0x66   : > { %3990 = vmatprep.subr.bf16.mxu0 %v4512_v27  ;;  %v5271_v47 = vpack.c.bf16 %v1042_v19, %v1040_v53  ;;  %v5926_v36 = vunpack.c.l.bf16 %v5245_v24  ;;  %v1047_v32 = vsel %vm1012_vm1, %v1044_v57, %v1046_v29  ;;  %v1050_v40 = vsel %vm1012_vm1, %v1048_v62, %v1049_v3 }
  0x67   : > { %v1051_v49 = vrot.slane %v5939_v61, 2  ;;  %v522_v53 = vsel %vm449_vm0, %v520_v56, %v521_v43  ;;  %v524_v19 = vsel %vm449_vm0, %v521_v43, %v523_v21  ;;  %v5940_v57 = vunpack.c.l.bf16 %v5010_v0 }
  0x68   : > { %v525_v29 = vrot.slane %v5926_v36, 1  ;;  %v5306_v21 = vpack.c.bf16 %v1047_v32, %v1045_v25  ;;  %v5308_v43 = vpack.c.bf16 %v524_v19, %v522_v53  ;;  %v528_v63 = vrot.slane %v5925_v33, 1 }
  0x69   : > { %3991 = vmatpush3.bf16.msra.mxu0 %v4512_v27  ;;  %v4516_v27 = vld [vmem:[%s5888_s1 + $0x198] sm:$0xff]   ;;  %v1052_v10 = vsel %vm1012_vm1, %v1049_v3, %v1051_v49  ;;  %v1053_v56 = vrot.slane %v5940_v57, 2  ;;  %v5941_v12 = vunpack.c.h.bf16 %v5010_v0  ;;  %v5942_v3 = vunpack.c.l.bf16 %v5020_v7 }
  0x6a   : > { %3992 = vmatprep.subr.bf16.mxu0 %v4514_v4  ;;  %v5943_v49 = vunpack.c.l.bf16 %v5044_v48  ;;  %v5944_v25 = vunpack.c.h.bf16 %v5044_v48  ;;  %v5322_v53 = vpack.c.bf16 %v1052_v10, %v1050_v40  ;;  %v5945_v19 = vunpack.c.l.bf16 %v5047_v18 }
  0x6b   : > { %3737 = vmatmul.mubr.bf16.gmra.mrb[20].mxu1 %v5257_v60  ;;  %v1054_v62 = vrot.slane %v5941_v12, 2  ;;  %v1056_v61 = vrot.slane %v5942_v3, 2  ;;  %v4523_v12 = vld [vmem:[%s5888_s1 + $0x1a8] sm:$0xff]   ;;  %v5946_v7 = vunpack.c.l.bf16 %v4845_v13  ;;  %v5947_v33 = vunpack.c.h.bf16 %v4845_v13 }
  0x6c   : > { %3961 = vmatmul.mubr.bf16.gmra.mrb[4].mxu0 %v5263_v22  ;;  %3740 = vmatprep.mubr.bf16.mxu1 %v5265_v2  ;;  %v1058_v57 = vrot.slane %v5943_v49, 2  ;;  %v1059_v32 = vrot.slane %v5944_v25, 2  ;;  %v5948_v18 = vunpack.c.l.bf16 %v4848_v14  ;;  %v5950_v14 = vunpack.c.h.bf16 %v5050_v59 }
  0x6d   : > { %3964 = vmatprep.mubr.bf16.mxu0 %v5271_v47  ;;  %3993 = vmatpush3.bf16.msra.mxu0 %v4514_v4  ;;  %v526_v4 = vrot.slane %v5924_v34, 1  ;;  %v1061_v34 = vrot.slane %v5945_v19, 2  ;;  %v1013_v3 = vrot.slane %v5946_v7, 2  ;;  %v1014_v49 = vrot.slane %v5947_v33, 2 }
  0x6e   : > { %3994 = vmatprep.subr.bf16.mxu0 %v4516_v27  ;;  %v1016_v10 = vrot.slane %v5948_v18, 2  ;;  %v1055_v25 = vsel %vm1012_vm1, %v1053_v56, %v1054_v62  ;;  %v1057_v19 = vsel %vm1012_vm1, %v1054_v62, %v1056_v61  ;;  %v1060_v33 = vsel %vm1012_vm1, %v1058_v57, %v1059_v32  ;;  %v4527_v56 = vld [vmem:[%s5888_s1 + $0x1b0] sm:$0xff]  }
  0x6f   : > { %v527_v40 = vsel %vm449_vm0, %v525_v29, %v526_v4  ;;  %v5343_v7 = vsel %vm1012_vm1, %v1013_v3, %v1014_v49  ;;  %v5949_v29 = vunpack.c.l.bf16 %v5050_v59  ;;  %v1062_v61 = vsel %vm1012_vm1, %v1059_v32, %v1061_v34 }
  0x70   : > { %v5355_v62 = vsel %vm1012_vm1, %v1014_v49, %v1016_v10  ;;  %v5951_v3 = vunpack.c.l.bf16 %v5080_v41  ;;  %v5952_v57 = vunpack.c.l.bf16 %v5110_v44  ;;  %v4531_v49 = vld [vmem:[%s5888_s1 + $0x1b8] sm:$0xff]   ;;  %v5371_v10 = vpack.c.bf16 %v1062_v61, %v1060_v33 }
  0x71   : > { %3995 = vmatpush3.bf16.msra.mxu0 %v4516_v27  ;;  %v529_v27 = vsel %vm449_vm0, %v526_v4, %v528_v63  ;;  %v1063_v4 = vrot.slane %v5949_v29, 2  ;;  %v1064_v63 = vrot.slane %v5950_v14, 2  ;;  %v1141_v29 = vpack.c.bf16 %v5355_v62, %v5343_v7  ;;  %v3020_v7 = vld [vmem:[%s4795_s13 + $0x8] sm:$0xff] }
  0x72   : > { %3996 = vmatprep.subr.bf16.mxu0 %v4519_v20  ;;  %v1066_v18 = vrot.slane %v5951_v3, 2  ;;  %v1068_v36 = vrot.slane %v5952_v57, 2  ;;  %v5366_v14 = vpack.c.bf16 %v1057_v19, %v1055_v25  ;;  %v5953_v41 = vunpack.c.h.bf16 %v5110_v44  ;;  %v4550_v62 = vld [vmem:[%s5888_s1 + $0xc8] sm:$0xff]  }
  0x73   : > { %3741 = vmatmul.mubr.bf16.gmra.mrb[24].mxu1 %v5295_v45  ;;  %v5954_v32 = vunpack.c.l.bf16 %v5113_v39  ;;  %v5388_v39 = vld [vmem:[%s5888_s1 + $0x1c0] sm:$0xff]   ;;  %v5955_v33 = vunpack.c.l.bf16 %v5140_v28  ;;  %v5958_v57 = vunpack.c.l.bf16 %v5173_v16 }
  0x74   : > { %3965 = vmatmul.mubr.bf16.gmra.mrb[8].mxu0 %v5306_v21  ;;  %3744 = vmatprep.mubr.bf16.mxu1 %v5308_v43  ;;  %v1069_v34 = vrot.slane %v5953_v41, 2 }
  0x75   : > { %3968 = vmatprep.mubr.bf16.mxu0 %v5322_v53  ;;  %3997 = vmatpush3.bf16.msra.mxu0 %v4519_v20  ;;  %v5364_v20 = vpack.c.bf16 %v529_v27, %v527_v40  ;;  %v1071_v3 = vrot.slane %v5954_v32, 2  ;;  %v1065_v40 = vsel %vm1012_vm1, %v1063_v4, %v1064_v63  ;;  %v1067_v27 = vsel %vm1012_vm1, %v1064_v63, %v1066_v18  ;;  %v4522_v18 = vld [vmem:[%s5888_s1 + $0x88] sm:$0xff]  }
  0x76   : > { %3998 = vmatprep.subr.bf16.mxu0 %v4523_v12  ;;  %v5390_v19 = vpack.c.bf16 %v1067_v27, %v1065_v40  ;;  %v1073_v4 = vrot.slane %v5955_v33, 2  ;;  %v5956_v63 = vunpack.c.h.bf16 %v5140_v28  ;;  %v1078_v41 = vrot.slane %v5958_v57, 2 }
  0x77   : > { %v1072_v25 = vsel %vm1012_vm1, %v1069_v34, %v1071_v3  ;;  %v5960_v3 = vunpack.c.l.bf16 %v5166_v37  ;;  %v4526_v37 = vld [vmem:[%s5888_s1 + $0x90] sm:$0xff]   ;;  %v5961_v33 = vunpack.c.h.bf16 %v5184_v50  ;;  %v5963_v57 = vunpack.c.l.bf16 %v5245_v24 }
  0x79   : > { %3999 = vmatpush3.bf16.msra.mxu0 %v4523_v12  ;;  %v1070_v12 = vsel %vm1012_vm1, %v1068_v36, %v1069_v34  ;;  %v5957_v36 = vunpack.c.l.bf16 %v5147_v42  ;;  %v5959_v34 = vunpack.c.h.bf16 %v5173_v16  ;;  %v1081_v40 = vrot.slane %v5960_v3, 2  ;;  %v5442_v3 = vld [vmem:[%s4800_s24 + $0xc0] sm:$0xff]  }
  0x7a   : > { %4000 = vmatprep.subr.bf16.mxu0 %v4527_v56 }
  0x7b   : > { %3745 = vmatmul.mubr.bf16.gmra.mrb[28].mxu1 %v5364_v20  ;;  %v1076_v61 = vrot.slane %v5957_v36, 2  ;;  %v1079_v32 = vrot.slane %v5959_v34, 2 }
  0x7c   : > { %3969 = vmatmul.mubr.bf16.gmra.mrb[12].mxu0 %v5366_v14  ;;  %3764 = vmatprep.mubr.bf16.mxu1 %v4845_v13  ;;  %v5392_v13 = vpack.c.bf16 %v1072_v25, %v1070_v12  ;;  %v1083_v25 = vrot.slane %v357_v54, 2  ;;  %v5965_v54 = vunpack.c.l.bf16 %v5254_v51  ;;  %v364_v51 = vunpack.c.h.bf16 %v5442_v3 }
  0x7d   : > { %3972 = vmatprep.mubr.bf16.mxu0 %v5371_v10  ;;  %4001 = vmatpush3.bf16.msra.mxu0 %v4527_v56  ;;  %v1074_v56 = vrot.slane %v5956_v63, 2  ;;  %v1080_v27 = vsel %vm1012_vm1, %v1078_v41, %v1079_v32  ;;  %v1082_v12 = vsel %vm1012_vm1, %v1079_v32, %v1081_v40  ;;  %v1088_v41 = vrot.slane %v5963_v57, 2  ;;  %v311_v40 = vld [vmem:[%s4800_s24 + $0xc8] sm:$0x1] }
  0x7e   : > { %4002 = vmatprep.subr.bf16.mxu0 %v4531_v49  ;;  %v5428_v63 = vpack.c.bf16 %v1082_v12, %v1080_v27  ;;  %v1091_v32 = vrot.slane %v5965_v54, 2  ;;  %v365_v27 = vunpack.c.l.bf16 %v311_v40  ;;  %v4542_v40 = vld [vmem:[%s5888_s1 + $0xb0] sm:$0xff]  }
  0x7f   : > { %v1075_v42 = vsel %vm1012_vm1, %v1073_v4, %v1074_v56  ;;  %v1084_v4 = vrot.slane %v5961_v33, 2 }
  0x80   : > { %v1662_v54 = vrot.slane %v365_v27, 1 }
  0x81   : > { %4003 = vmatpush3.bf16.msra.mxu0 %v4531_v49  ;;  %v1077_v49 = vsel %vm1012_vm1, %v1074_v56, %v1076_v61  ;;  %v5962_v56 = vunpack.c.l.bf16 %v5211_v1  ;;  %v4530_v61 = vld [vmem:[%s5888_s1 + $0x98] sm:$0xff]   ;;  %v1085_v1 = vsel %vm1012_vm1, %v1083_v25, %v1084_v4 }
  0x82   : > { %4036 = vmatprep.subr.bf16.mxu0 %v5388_v39 }
  0x83   : > { %3765 = vmatmul.mubr.bf16.vlgmr.msra.gmra.mrb[0].mxu1 %v4851_v15  ;;  %v1086_v36 = vrot.slane %v5962_v56, 2  ;;  %v4534_v56 = vld [vmem:[%s5888_s1 + $0xa0] sm:$0xff]  }
  0x84   : > { %3973 = vmatmul.mubr.bf16.gmra.mrb[16].mxu0 %v5390_v19  ;;  %3797 = vmatpush3.bf16.msra.mxu1 %v5216_v52  ;;  %v5422_v52 = vpack.c.bf16 %v1077_v49, %v1075_v42  ;;  %v363_v49 = vunpack.c.l.bf16 %v5442_v3 }
  0x85   : > { %3768 = vmatprep.mubr.bf16.mxu1 %v4863_v23  ;;  %3976 = vmatprep.mubr.bf16.mxu0 %v5392_v13  ;;  %v1087_v42 = vsel %vm1012_vm1, %v1084_v4, %v1086_v36  ;;  %v1927_v36 = vrot.slane %v365_v27, 2  ;;  %v4548_v27 = vld [vmem:[%s5888_s1 + $0xc0] sm:$0xff]  }
  0x86   : > { %3798 = vmatprep.subr.bf16.mxu1 %v4522_v18  ;;  %v5458_v25 = vpack.c.bf16 %v1087_v42, %v1085_v1  ;;  %v1924_v4 = vrot.slane %v363_v49, 2 }
  0x88   : > { %3799 = vmatpush3.bf16.msra.mxu1 %v4522_v18  ;;  %v5964_v18 = vunpack.c.h.bf16 %v5245_v24 }
  0x89   : > { %3800 = vmatprep.subr.bf16.mxu1 %v4526_v37 }
  0x8a   : > { %v1089_v34 = vrot.slane %v5964_v18, 2  ;;  %v1659_v18 = vrot.slane %v363_v49, 1 }
  0x8b   : > { %3769 = vmatmul.mubr.bf16.gmra.mrb[4].mxu1 %v4892_v38 }
  0x8c   : > { %3977 = vmatmul.mubr.bf16.gmra.mrb[20].mxu0 %v5422_v52  ;;  %3772 = vmatprep.mubr.bf16.mxu1 %v4905_v46  ;;  %v1090_v12 = vsel %vm1012_vm1, %v1088_v41, %v1089_v34  ;;  %v1092_v33 = vsel %vm1012_vm1, %v1089_v34, %v1091_v32  ;;  %v4538_v41 = vld [vmem:[%s5888_s1 + $0xa8] sm:$0xff]   ;;  %v1660_v34 = vrot.slane %v364_v51, 1 }
  0x8d   : > { %3980 = vmatprep.mubr.bf16.mxu0 %v5428_v63  ;;  %3801 = vmatpush3.bf16.msra.mxu1 %v4526_v37  ;;  %v5460_v57 = vpack.c.bf16 %v1092_v33, %v1090_v12  ;;  %v1925_v37 = vrot.slane %v364_v51, 2  ;;  %v4546_v51 = vld [vmem:[%s5888_s1 + $0xb8] sm:$0xff]   ;;  %v4539_v33 = vld [vmem:[%s5888_s1 + $0x1c8] sm:$0xff]  }
  0x8e   : > { %3802 = vmatprep.subr.bf16.mxu1 %v4530_v61  ;;  %v1661_v1 = vsel %vm449_vm0, %v1659_v18, %v1660_v34  ;;  %v1663_v42 = vsel %vm449_vm0, %v1660_v34, %v1662_v54  ;;  %v3019_v18 = vld [vmem:[%s4795_s13] sm:$0xff]  ;;  %v3021_v34 = vld [vmem:[%s4795_s13 + $0x10] sm:$0xff] }
  0x8f   : > { %v1926_v32 = vsel %vm1012_vm1, %v1924_v4, %v1925_v37  ;;  %v5476_v12 = vpack.c.bf16 %v1663_v42, %v1661_v1  ;;  %v4547_v4 = vld [vmem:[%s5888_s1 + $0x1d8] sm:$0xff]   ;;  %v5535_v54 = vld [vmem:[%s5888_s1 + $0x200] sm:$0xff]   ;;  %v3025_v1 = vld [vmem:[%s4795_s13 + $0x30] sm:$0xff] }
  0x90   : > { %v4555_v42 = vld [vmem:[%s5888_s1 + $0xd8] sm:$0xff]  }
  0x91   : > { %3803 = vmatpush3.bf16.msra.mxu1 %v4530_v61  ;;  %v1928_v61 = vsel %vm1012_vm1, %v1925_v37, %v1927_v36  ;;  %v4551_v37 = vld [vmem:[%s5888_s1 + $0x1e8] sm:$0xff]   ;;  %v4553_v36 = vld [vmem:[%s5888_s1 + $0x1f0] sm:$0xff]  }
  0x92   : > { %3804 = vmatprep.subr.bf16.mxu1 %v4534_v56  ;;  %v5478_v49 = vpack.c.bf16 %v1928_v61, %v1926_v32  ;;  %v4693_v32 = vmov 0   ;;  %v3023_v61 = vld [vmem:[%s4795_s13 + $0x20] sm:$0xff] }
  0x93   : > { %3773 = vmatmul.mubr.bf16.gmra.mrb[8].mxu1 %v4927_v58  ;;  %4478 = vset.pattern.permute.xlu0 %v4693_v32 }
  0x94   : > { %3981 = vmatmul.mubr.bf16.gmra.mrb[24].mxu0 %v5458_v25  ;;  %3776 = vmatprep.mubr.bf16.mxu1 %v4957_v11 }
  0x95   : > { %3984 = vmatprep.mubr.bf16.mxu0 %v5460_v57  ;;  %3805 = vmatpush3.bf16.msra.mxu1 %v4534_v56  ;;  %v4543_v56 = vld [vmem:[%s5888_s1 + $0x1d0] sm:$0xff]  }
  0x96   : > { %3806 = vmatprep.subr.bf16.mxu1 %v4538_v41  ;;  %3053 = vperm.xlu0 %4478, %v3019_v18  }
  0x97   : > { %4479 = vset.pattern.permute.xlu1 %v4693_v32  ;;  %v3031_v32 = vld [vmem:[%s4795_s13 + $0x60] sm:$0xff] }
  0x98   : > { %3063 = vperm.xlu1 %4479, %v3021_v34   ;;  %v3030_v34 = vld [vmem:[%s4795_s13 + $0x58] sm:$0xff] }
  0x99   : > { %3807 = vmatpush3.bf16.msra.mxu1 %v4538_v41  ;;  %v4557_v41 = vld [vmem:[%s5888_s1 + $0x1f8] sm:$0xff]  }
  0x9a   : > { %3808 = vmatprep.subr.bf16.mxu1 %v4542_v40  ;;  %3058 = vperm.xlu0 %4478, %v3020_v7  }
  0x9b   : > { %3777 = vmatmul.mubr.bf16.gmra.mrb[12].mxu1 %v4977_v31 }
  0x9c   : > { %3985 = vmatmul.mubr.bf16.gmra.mrb[28].mxu0 %v5478_v49  ;;  %3780 = vmatprep.mubr.bf16.mxu1 %v5010_v0 }
  0x9d   : > { %4004 = vmatprep.mubr.bf16.mxu0 %v4863_v23  ;;  %3809 = vmatpush3.bf16.msra.mxu1 %v4542_v40  ;;  %v4552_v40 = vld [vmem:[%s5888_s1 + $0xd0] sm:$0xff]  }
  0x9e   : > { %3810 = vmatprep.subr.bf16.mxu1 %v4546_v51  ;;  %3073 = vperm.xlu0 %4478, %v3023_v61   ;;  %v4562_v61 = vld [vmem:[%s5888_s1 + $0xf0] sm:$0xff]  }
  0xa1   : > { %3811 = vmatpush3.bf16.msra.mxu1 %v4546_v51  ;;  %v3026_v51 = vld [vmem:[%s4795_s13 + $0x38] sm:$0xff] }
  0xa2   : > { %3844 = vmatprep.subr.bf16.mxu1 %v4548_v27  ;;  %3083 = vperm.xlu0 %4478, %v3025_v1   ;;  %v3033_v1 = vld [vmem:[%s4795_s13 + $0x70] sm:$0xff] }
  0xa3   : > { %3781 = vmatmul.mubr.bf16.gmra.mrb[16].mxu1 %v5044_v48 }
  0xa4   : > { %4005 = vmatmul.mubr.bf16.vlgmr.msra.gmra.mrb[0].mxu0 %v4892_v38  ;;  %3784 = vmatprep.mubr.bf16.mxu1 %v5050_v59 }
  0xa5   : > { %4037 = vmatpush3.bf16.msra.mxu0 %v5388_v39  ;;  %4008 = vmatprep.mubr.bf16.mxu0 %v4905_v46  ;;  %v4549_v39 = vld [vmem:[%s5888_s1 + $0x1e0] sm:$0xff]  }
  0xa6   : > { %4038 = vmatprep.subr.bf16.mxu0 %v4539_v33 }
  0xa9   : > { %4039 = vmatpush3.bf16.msra.mxu0 %v4539_v33  ;;  %v4558_v33 = vld [vmem:[%s5888_s1 + $0xe0] sm:$0xff]  }
  0xaa   : > { %4040 = vmatprep.subr.bf16.mxu0 %v4543_v56 }
  0xab   : > { %3785 = vmatmul.mubr.bf16.gmra.mrb[20].mxu1 %v5110_v44 }
  0xac   : > { %4009 = vmatmul.mubr.bf16.gmra.mrb[4].mxu0 %v4927_v58  ;;  %3788 = vmatprep.mubr.bf16.mxu1 %v5140_v28 }
  0xad   : > { %4012 = vmatprep.mubr.bf16.mxu0 %v4957_v11  ;;  %4041 = vmatpush3.bf16.msra.mxu0 %v4543_v56  ;;  %v3028_v56 = vld [vmem:[%s4795_s13 + $0x48] sm:$0xff] }
  0xae   : > { %4042 = vmatprep.subr.bf16.mxu0 %v4547_v4 }
  0xb1   : > { %4043 = vmatpush3.bf16.msra.mxu0 %v4547_v4  ;;  %v3029_v4 = vld [vmem:[%s4795_s13 + $0x50] sm:$0xff] }
  0xb2   : > { %4044 = vmatprep.subr.bf16.mxu0 %v4549_v39 }
  0xb3   : > { %3789 = vmatmul.mubr.bf16.gmra.mrb[24].mxu1 %v5173_v16 }
  0xb4   : > { %4013 = vmatmul.mubr.bf16.gmra.mrb[8].mxu0 %v4977_v31  ;;  %3792 = vmatprep.mubr.bf16.mxu1 %v5184_v50 }
  0xb5   : > { %4016 = vmatprep.mubr.bf16.mxu0 %v5010_v0  ;;  %4045 = vmatpush3.bf16.msra.mxu0 %v4549_v39  ;;  %v5568_v39 = vld [vmem:[%s4800_s24 + $0xcc] sm:$0xff]  }
  0xb6   : > { %4046 = vmatprep.subr.bf16.mxu0 %v4551_v37  ;;  %v367_v18 = vunpack.c.h.bf16 %v5568_v39 }
  0xb9   : > { %4047 = vmatpush3.bf16.msra.mxu0 %v4551_v37  ;;  %v4560_v37 = vld [vmem:[%s5888_s1 + $0xe8] sm:$0xff]  }
  0xba   : > { %4048 = vmatprep.subr.bf16.mxu0 %v4553_v36 }
  0xbb   : > { %3793 = vmatmul.mubr.bf16.gmra.mrb[28].mxu1 %v5245_v24 }
  0xbc   : > { %4017 = vmatmul.mubr.bf16.gmra.mrb[12].mxu0 %v5044_v48  ;;  %3812 = vmatprep.mubr.bf16.mxu1 %v1141_v29  ;;  %v3022_v29 = vld [vmem:[%s4795_s13 + $0x18] sm:$0xff] }
  0xbd   : > { %4020 = vmatprep.mubr.bf16.mxu0 %v5050_v59  ;;  %4049 = vmatpush3.bf16.msra.mxu0 %v4553_v36  ;;  %v5574_v36 = vld [vmem:[%s4800_s24 + $0xd4] sm:$0x1] }
  0xbe   : > { %4050 = vmatprep.subr.bf16.mxu0 %v4557_v41  ;;  %3068 = vperm.xlu1 %4479, %v3022_v29   ;;  %v368_v29 = vunpack.c.l.bf16 %v5574_v36  ;;  %v4593_v36 = vld [vmem:[%s5888_s1 + $0x128] sm:$0xff]  }
  0xc1   : > { %4051 = vmatpush3.bf16.msra.mxu0 %v4557_v41  ;;  %v366_v41 = vunpack.c.l.bf16 %v5568_v39 }
  0xc2   : > { %4084 = vmatprep.subr.bf16.mxu0 %v5535_v54 }
  0xc3   : > { %3813 = vmatmul.mubr.bf16.vlgmr.msra.gmra.mrb[0].mxu1 %v5135_v8  ;;  %v3024_v8 = vld [vmem:[%s4795_s13 + $0x28] sm:$0xff]  ;;  %v2715_v7 = vrot.slane %v366_v41, 2 }
  0xc4   : > { %4021 = vmatmul.mubr.bf16.gmra.mrb[16].mxu0 %v5110_v44  ;;  %3845 = vmatpush3.bf16.msra.mxu1 %v4548_v27  ;;  %v3027_v27 = vld [vmem:[%s4795_s13 + $0x40] sm:$0xff] }
  0xc5   : > { %3816 = vmatprep.mubr.bf16.mxu1 %v5177_v6  ;;  %4024 = vmatprep.mubr.bf16.mxu0 %v5140_v28 }
  0xc6   : > { %3846 = vmatprep.subr.bf16.mxu1 %v4550_v62  ;;  %3078 = vperm.xlu1 %4479, %v3024_v8   ;;  %v2718_v8 = vrot.slane %v368_v29, 2 }
  0xc7   : > { %3093 = vperm.xlu0 %4478, %v3027_v27   ;;  %v4564_v27 = vld [vmem:[%s5888_s1 + $0xf8] sm:$0xff]  }
  0xc8   : > { %3847 = vmatpush3.bf16.msra.mxu1 %v4550_v62  ;;  %v2716_v62 = vrot.slane %v367_v18, 2 }
  0xc9   : > { %3848 = vmatprep.subr.bf16.mxu1 %v4552_v40 }
  0xca   : > { %3088 = vperm.xlu1 %4479, %v3026_v51   ;;  %v5600_v51 = vsel %vm1012_vm1, %v2716_v62, %v2718_v8  ;;  %v3041_v8 = vld [vmem:[%s4795_s13 + $0xb0] sm:$0xff] }
  0xcb   : > { %3817 = vmatmul.mubr.bf16.gmra.mrb[4].mxu1 %v5188_v35  ;;  %3103 = vperm.xlu0 %4478, %v3029_v4   ;;  %v3035_v4 = vld [vmem:[%s4795_s13 + $0x80] sm:$0xff] }
  0xcc   : > { %4025 = vmatmul.mubr.bf16.gmra.mrb[20].mxu0 %v5173_v16  ;;  %3820 = vmatprep.mubr.bf16.mxu1 %v5263_v22 }
  0xcd   : > { %4028 = vmatprep.mubr.bf16.mxu0 %v5184_v50  ;;  %3849 = vmatpush3.bf16.msra.mxu1 %v4552_v40  ;;  %v3032_v40 = vld [vmem:[%s4795_s13 + $0x68] sm:$0xff] }
  0xce   : > { %3850 = vmatprep.subr.bf16.mxu1 %v4555_v42  ;;  %3098 = vperm.xlu1 %4479, %v3028_v56   ;;  %v3034_v56 = vld [vmem:[%s4795_s13 + $0x78] sm:$0xff] }
  0xcf   : > { %3113 = vperm.xlu0 %4478, %v3031_v32   ;;  %v4561_v32 = vld [vmem:[%s5888_s1 + $0x208] sm:$0xff]  }
  0xd1   : > { %3851 = vmatpush3.bf16.msra.mxu1 %v4555_v42  ;;  %v5597_v42 = vsel %vm1012_vm1, %v2715_v7, %v2716_v62  ;;  %v5621_v7 = vld [vmem:[%s5888_s1 + $0x100] sm:$0xff]  }
  0xd2   : > { %3852 = vmatprep.subr.bf16.mxu1 %v4558_v33  ;;  %3108 = vperm.xlu1 %4479, %v3030_v34   ;;  %v3037_v34 = vld [vmem:[%s4795_s13 + $0x90] sm:$0xff]  ;;  %v3039_v62 = vld [vmem:[%s4795_s13 + $0xa0] sm:$0xff] }
  0xd3   : > { %3821 = vmatmul.mubr.bf16.gmra.mrb[8].mxu1 %v5271_v47  ;;  %3123 = vperm.xlu0 %4478, %v3033_v1   ;;  %v4566_v1 = vld [vmem:[%s5888_s1 + $0x220] sm:$0xff]  }
  0xd4   : > { %4029 = vmatmul.mubr.bf16.gmra.mrb[24].mxu0 %v5245_v24  ;;  %3824 = vmatprep.mubr.bf16.mxu1 %v5306_v21 }
  0xd5   : > { %4032 = vmatprep.mubr.bf16.mxu0 %v5442_v3  ;;  %3853 = vmatpush3.bf16.msra.mxu1 %v4558_v33  ;;  %v2738_v33 = vpack.c.bf16 %v5600_v51, %v5597_v42 }
  0xd6   : > { %3854 = vmatprep.subr.bf16.mxu1 %v4560_v37  ;;  %3118 = vperm.xlu1 %4479, %v3032_v40   ;;  %v3040_v40 = vld [vmem:[%s4795_s13 + $0xa8] sm:$0xff] }
  0xd7   : > { %3133 = vperm.xlu0 %4478, %v3035_v4   ;;  %v3047_v4 = vld [vmem:[%s4795_s13 + $0xe0] sm:$0xff] }
  0xd9   : > { %3855 = vmatpush3.bf16.msra.mxu1 %v4560_v37  ;;  %v3036_v37 = vld [vmem:[%s4795_s13 + $0x88] sm:$0xff] }
  0xda   : > { %3856 = vmatprep.subr.bf16.mxu1 %v4562_v61  ;;  %3128 = vperm.xlu1 %4479, %v3034_v56   ;;  %v3045_v56 = vld [vmem:[%s4795_s13 + $0xd0] sm:$0xff] }
  0xdb   : > { %3825 = vmatmul.mubr.bf16.gmra.mrb[12].mxu1 %v5322_v53  ;;  %3143 = vperm.xlu0 %4478, %v3037_v34   ;;  %v4568_v34 = vld [vmem:[%s5888_s1 + $0x230] sm:$0xff]  }
  0xdc   : > { %4033 = vmatmul.mubr.bf16.gmra.mrb[28].mxu0 %v5568_v39  ;;  %3828 = vmatprep.mubr.bf16.mxu1 %v5366_v14 }
  0xdd   : > { %4052 = vmatprep.mubr.bf16.mxu0 %v4952_v9  ;;  %3857 = vmatpush3.bf16.msra.mxu1 %v4562_v61  ;;  %v3038_v9 = vld [vmem:[%s4795_s13 + $0x98] sm:$0xff]  ;;  %v4563_v61 = vld [vmem:[%s5888_s1 + $0x210] sm:$0xff]  }
  0xde   : > { %3858 = vmatprep.subr.bf16.mxu1 %v4564_v27  ;;  %3138 = vperm.xlu1 %4479, %v3036_v37   ;;  %v5966_v37 = vld [vmem:[#allocation5_spill] sm:$0xff] }
  0xdf   : > { %3153 = vperm.xlu0 %4478, %v3039_v62   ;;  %v3050_v62 = vld [vmem:[%s4795_s13 + $0xf8] sm:$0xff] }
  0xe1   : > { %3859 = vmatpush3.bf16.msra.mxu1 %v4564_v27  ;;  %v3044_v27 = vld [vmem:[%s4795_s13 + $0xc8] sm:$0xff] }
  0xe2   : > { %4132 = vmatprep.subr.bf16.mxu1 %v5621_v7  ;;  %3148 = vperm.xlu1 %4479, %v3038_v9   ;;  %v3049_v9 = vld [vmem:[%s4795_s13 + $0xf0] sm:$0xff] }
  0xe3   : > { %3829 = vmatmul.mubr.bf16.gmra.mrb[16].mxu1 %v5371_v10  ;;  %3163 = vperm.xlu0 %4478, %v3041_v8   ;;  %v4590_v8 = vld [vmem:[%s5888_s1 + $0x110] sm:$0xff]  }
  0xe4   : > { %4053 = vmatmul.mubr.bf16.vlgmr.msra.gmra.mrb[0].mxu0 %v4965_v26  ;;  %3832 = vmatprep.mubr.bf16.mxu1 %v5390_v19  ;;  %v4565_v26 = vld [vmem:[%s5888_s1 + $0x218] sm:$0xff]  }
  0xe5   : > { %4085 = vmatpush3.bf16.msra.mxu0 %v5535_v54  ;;  %4056 = vmatprep.mubr.bf16.mxu0 %v5001_v55  ;;  %v3042_v55 = vld [vmem:[%s4795_s13 + $0xb8] sm:$0xff]  ;;  %v3043_v54 = vld [vmem:[%s4795_s13 + $0xc0] sm:$0xff] }
  0xe6   : > { %4086 = vmatprep.subr.bf16.mxu0 %v4561_v32  ;;  %3158 = vperm.xlu1 %4479, %v3040_v40   ;;  %v5968_v40 = vld [vmem:[#allocation7_spill] sm:$0xff] }
  0xe7   : > { %3173 = vperm.xlu0 %4478, %v3043_v54  }
  0xe9   : > { %4087 = vmatpush3.bf16.msra.mxu0 %v4561_v32  ;;  %v3048_v32 = vld [vmem:[%s4795_s13 + $0xe8] sm:$0xff] }
  0xea   : > { %4088 = vmatprep.subr.bf16.mxu0 %v4563_v61  ;;  %3168 = vperm.xlu1 %4479, %v3042_v55  }
  0xeb   : > { %3833 = vmatmul.mubr.bf16.gmra.mrb[20].mxu1 %v5392_v13  ;;  %3183 = vperm.xlu0 %4478, %v3045_v56  }
  0xec   : > { %4057 = vmatmul.mubr.bf16.gmra.mrb[4].mxu0 %v5015_v5  ;;  %3836 = vmatprep.mubr.bf16.mxu1 %v5422_v52  ;;  %v4567_v5 = vld [vmem:[%s5888_s1 + $0x228] sm:$0xff]  }
  0xed   : > { %4060 = vmatprep.mubr.bf16.mxu0 %v5056_v17  ;;  %4089 = vmatpush3.bf16.msra.mxu0 %v4563_v61  ;;  %v3046_v17 = vld [vmem:[%s4795_s13 + $0xd8] sm:$0xff]  ;;  %v5967_v61 = vld [vmem:[#allocation6_spill] sm:$0xff]  ;;  %s4602_s13 = scalar_lea.vmem %s4601_s10, 32 }
  0xee   : > { %4090 = vmatprep.subr.bf16.mxu0 %v4565_v26  ;;  %3178 = vperm.xlu1 %4479, %v3044_v27   ;;  %p4604_p5 = scmp.lt.s32.totalorder %s4602_s13, %s4596_s8 }
  0xef   : > { %3193 = vperm.xlu0 %4478, %v3047_v4  }
  0xf0   : > { %p4605_p6 = por %p4604_p5, %p4603_p4 }
  0xf1   : > { %4091 = vmatpush3.bf16.msra.mxu0 %v4565_v26 }
  0xf2   : > { %4092 = vmatprep.subr.bf16.mxu0 %v4566_v1  ;;  %3188 = vperm.xlu1 %4479, %v3046_v17   ;;  %p4606_p7 = pnand %p4605_p6, %p4599_p2 }
  0xf3   : > { %3837 = vmatmul.mubr.bf16.gmra.mrb[24].mxu1 %v5428_v63  ;;  %3203 = vperm.xlu0 %4478, %v3049_v9  }
  0xf4   : > { %4061 = vmatmul.mubr.bf16.gmra.mrb[8].mxu0 %v5075_v30  ;;  %3840 = vmatprep.mubr.bf16.mxu1 %v5458_v25  ;;  %v4569_v30 = vld [vmem:[%s5888_s1 + $0x238] sm:$0xff]  }
  0xf5   : > { %4064 = vmatprep.mubr.bf16.mxu0 %v5966_v37  ;;  %4093 = vmatpush3.bf16.msra.mxu0 %v4566_v1 }
  0xf6   : > { %4094 = vmatprep.subr.bf16.mxu0 %v4567_v5  ;;  %3198 = vperm.xlu1 %4479, %v3048_v32  }
  0xf9   : > { %4095 = vmatpush3.bf16.msra.mxu0 %v4567_v5 }
  0xfa   : > { %4096 = vmatprep.subr.bf16.mxu0 %v4568_v34  ;;  %3208 = vperm.xlu1 %4479, %v3050_v62  }
  0xfb   : > { %3841 = vmatmul.mubr.bf16.gmra.mrb[28].mxu1 %v5460_v57 }
  0xfc   : > { %4065 = vmatmul.mubr.bf16.gmra.mrb[12].mxu0 %v5967_v61  ;;  %3860 = vmatprep.mubr.bf16.mxu1 %v4851_v15  ;;  %v4589_v15 = vld [vmem:[%s5888_s1 + $0x108] sm:$0xff]  }
  0xfd   : > { %4068 = vmatprep.mubr.bf16.mxu0 %v5968_v40  ;;  %4097 = vmatpush3.bf16.msra.mxu0 %v4568_v34 }
  0xfe   : > { %4098 = vmatprep.subr.bf16.mxu0 %v4569_v30 }
 0x101   : > { %4099 = vmatpush3.bf16.msra.mxu0 %v4569_v30 }
 0x103   : > { %3861 = vmatmul.mubr.bf16.vlgmr.msra.gmra.mrb[0].mxu1 %v4863_v23  ;;  %v4591_v23 = vld [vmem:[%s5888_s1 + $0x118] sm:$0xff]  }
 0x104   : > { %4069 = vmatmul.mubr.bf16.gmra.mrb[16].mxu0 %v5257_v60  ;;  %4140 = vmatpush3.bf16.msra.mxu1 %v5621_v7  ;;  %v2451_v7 = vrot.slane %v367_v18, 1 }
 0x105   : > { %3864 = vmatprep.mubr.bf16.mxu1 %v4892_v38  ;;  %4072 = vmatprep.mubr.bf16.mxu0 %v5265_v2  ;;  %v2450_v38 = vrot.slane %v366_v41, 1 }
 0x106   : > { %4133 = vmatprep.subr.bf16.mxu1 %v4589_v15 }
 0x107   : > { %v2452_v39 = vsel %vm449_vm0, %v2450_v38, %v2451_v7 }
 0x108   : > { %4141 = vmatpush3.bf16.msra.mxu1 %v4589_v15 }
 0x109   : > { %4134 = vmatprep.subr.bf16.mxu1 %v4590_v8 }
 0x10b   : > { %3865 = vmatmul.mubr.bf16.gmra.mrb[4].mxu1 %v4905_v46  ;;  %v2453_v46 = vrot.slane %v368_v29, 1  ;;  %v5768_v29 = vld [vmem:[%s5889_s2] ss:$0 sm:$0xff] }
 0x10c   : > { %4073 = vmatmul.mubr.bf16.gmra.mrb[20].mxu0 %v5295_v45  ;;  %3868 = vmatprep.mubr.bf16.mxu1 %v4927_v58  ;;  %v4592_v58 = vld [vmem:[%s5888_s1 + $0x120] sm:$0xff]  }
 0x10d   : > { %4076 = vmatprep.mubr.bf16.mxu0 %v5308_v43  ;;  %4142 = vmatpush3.bf16.msra.mxu1 %v4590_v8  ;;  %v2454_v41 = vsel %vm449_vm0, %v2451_v7, %v2453_v46 }
 0x10e   : > { %4135 = vmatprep.subr.bf16.mxu1 %v4591_v23  ;;  %v2473_v18 = vpack.c.bf16 %v2454_v41, %v2452_v39 }
 0x111   : > { %4143 = vmatpush3.bf16.msra.mxu1 %v4591_v23 }
 0x112   : > { %4136 = vmatprep.subr.bf16.mxu1 %v4592_v58 }
 0x113   : > { %3869 = vmatmul.mubr.bf16.gmra.mrb[8].mxu1 %v4957_v11  ;;  %v4594_v11 = vld [vmem:[%s5888_s1 + $0x130] sm:$0xff]  }
 0x114   : > { %4077 = vmatmul.mubr.bf16.gmra.mrb[24].mxu0 %v5364_v20  ;;  %3872 = vmatprep.mubr.bf16.mxu1 %v4977_v31  ;;  %v4595_v31 = vld [vmem:[%s5888_s1 + $0x138] sm:$0xff]  }
 0x115   : > { %4080 = vmatprep.mubr.bf16.mxu0 %v5476_v12  ;;  %4144 = vmatpush3.bf16.msra.mxu1 %v4592_v58 }
 0x116   : > { %4137 = vmatprep.subr.bf16.mxu1 %v4593_v36 }
 0x119   : > { %4145 = vmatpush3.bf16.msra.mxu1 %v4593_v36 }
 0x11a   : > { %4138 = vmatprep.subr.bf16.mxu1 %v4594_v11 }
 0x11b   : > { %3873 = vmatmul.mubr.bf16.gmra.mrb[12].mxu1 %v5010_v0 }
 0x11c   : > { %4081 = vmatmul.mubr.bf16.gmra.mrb[28].mxu0 %v2473_v18  ;;  %3876 = vmatprep.mubr.bf16.mxu1 %v5044_v48 }
 0x11d   : > { %4100 = vmatprep.mubr.bf16.mxu0 %v5177_v6  ;;  %4146 = vmatpush3.bf16.msra.mxu1 %v4594_v11 }
 0x11e   : > { %4139 = vmatprep.subr.bf16.mxu1 %v4595_v31 }
 0x121   : > { %4147 = vmatpush3.bf16.msra.mxu1 %v4595_v31 }
 0x123   : > { %3877 = vmatmul.mubr.bf16.gmra.mrb[16].mxu1 %v5050_v59  ;;  %v3064_v59 = vpop.permute.xlu1 %3063 }
 0x124   : > { %4101 = vmatmul.mubr.bf16.vlgmr.msra.gmra.mrb[0].mxu0 %v5188_v35  ;;  %3880 = vmatprep.mubr.bf16.mxu1 %v5110_v44 }
 0x125   : > { %4104 = vmatprep.mubr.bf16.mxu0 %v5263_v22 }
 0x12b   : > { %3881 = vmatmul.mubr.bf16.gmra.mrb[20].mxu1 %v5140_v28  ;;  %v3054_v28 = vpop.permute.xlu0 %3053 }
 0x12c   : > { %4105 = vmatmul.mubr.bf16.gmra.mrb[4].mxu0 %v5271_v47  ;;  %3884 = vmatprep.mubr.bf16.mxu1 %v5173_v16 }
 0x12d   : > { %4108 = vmatprep.mubr.bf16.mxu0 %v5306_v21 }
 0x12f   : > { %v3059_v47 = vpop.permute.xlu0 %3058 }
 0x133   : > { %3885 = vmatmul.mubr.bf16.gmra.mrb[24].mxu1 %v5184_v50 }
 0x134   : > { %4109 = vmatmul.mubr.bf16.gmra.mrb[8].mxu0 %v5322_v53  ;;  %3888 = vmatprep.mubr.bf16.mxu1 %v5245_v24  ;;  %v3074_v24 = vpop.permute.xlu0 %3073 }
 0x135   : > { %4112 = vmatprep.mubr.bf16.mxu0 %v5366_v14 }
 0x13b   : > { %3889 = vmatmul.mubr.bf16.gmra.mrb[28].mxu1 %v5442_v3 }
 0x13c   : > { %4113 = vmatmul.mubr.bf16.gmra.mrb[12].mxu0 %v5371_v10  ;;  %3924 = vmatprep.mubr.bf16.mxu1 %v5967_v61 }
 0x13d   : > { %4116 = vmatprep.mubr.bf16.mxu0 %v5390_v19  ;;  %v3069_v6 = vpop.permute.xlu1 %3068 }
 0x143   : > { %3925 = vmatmul.mubr.bf16.vlgmr.msra.gmra.mrb[16].mxu1 %v5968_v40 }
 0x144   : > { %4117 = vmatmul.mubr.bf16.gmra.mrb[16].mxu0 %v5392_v13  ;;  %3928 = vmatprep.mubr.bf16.mxu1 %v5257_v60 }
 0x145   : > { %4120 = vmatprep.mubr.bf16.mxu0 %v5422_v52 }
 0x14b   : > { %3929 = vmatmul.mubr.bf16.gmra.mrb[20].mxu1 %v5265_v2  ;;  %v3079_v2 = vpop.permute.xlu1 %3078 }
 0x14c   : > { %4121 = vmatmul.mubr.bf16.gmra.mrb[20].mxu0 %v5428_v63  ;;  %3932 = vmatprep.mubr.bf16.mxu1 %v5295_v45 }
 0x14d   : > { %4124 = vmatprep.mubr.bf16.mxu0 %v5458_v25 }
 0x14f   : > { %v3089_v14 = vpop.permute.xlu1 %3088 }
 0x153   : > { %3933 = vmatmul.mubr.bf16.gmra.mrb[24].mxu1 %v5308_v43  ;;  %v5759_v3 = vpop.permute.xlu1 %3098 }
 0x154   : > { %4125 = vmatmul.mubr.bf16.gmra.mrb[24].mxu0 %v5460_v57  ;;  %3936 = vmatprep.mubr.bf16.mxu1 %v5364_v20  ;;  %v3084_v20 = vpop.permute.xlu0 %3083 }
 0x155   : > { %4128 = vmatprep.mubr.bf16.mxu0 %v5478_v49 }
 0x158   : > { %v3094_v52 = vpop.permute.xlu0 %3093 }
 0x15b   : > { %3937 = vmatmul.mubr.bf16.gmra.mrb[28].mxu1 %v5476_v12  ;;  %v5763_v12 = vpop.permute.xlu1 %3108 }
 0x15c   : > { %4129 = vmatmul.mubr.bf16.gmra.mrb[28].mxu0 %v2738_v33  ;;  %v5761_v25 = vpop.permute.xlu0 %3103 }
 0x15f   : > { %v5775_v17 = vpop.permute.xlu1 %3118 }
 0x160   : > { %v5771_v27 = vpop.permute.xlu0 %3113 }
 0x163   : > { %v5781_v41 = vpop.permute.xlu1 %3128 }
 0x164   : > { %v5778_v38 = vpop.permute.xlu0 %3123 }
 0x1d6   : > { %v3862_v35 = vpop.f32.mrb[0].mxu1 }
 0x1d7   : > { %v1497_v44 = vpop.f32.mrb[1].mxu1 }
 0x1d8   : > { %v3863_v0 = vpop.f32.mrb[2].mxu1 }
 0x1d9   : > { %v1500_v48 = vpop.f32.mrb[3].mxu1 }
 0x1de   : > { %v3866_v22 = vpop.f32.mrb[4].mxu1 }
 0x1df   : > { %v1513_v16 = vpop.f32.mrb[5].mxu1 }
 0x1e0   : > { %v3867_v50 = vpop.f32.mrb[6].mxu1 }
 0x1e1   : > { %v1516_v60 = vpop.f32.mrb[7].mxu1 }
 0x1e6   : > { %v3870_v45 = vpop.f32.mrb[8].mxu1 }
 0x1e7   : > { %v1529_v21 = vpop.f32.mrb[9].mxu1 }
 0x1e8   : > { %v3871_v43 = vpop.f32.mrb[10].mxu1 }
 0x1e9   : > { %v5749_v53 = vpop.f32.mrb[11].mxu1 }
 0x1ee   : > { %v5751_v10 = vpop.f32.mrb[12].mxu1 }
 0x1ef   : > { %v5753_v19 = vpop.f32.mrb[13].mxu1 }
 0x1f0   : > { %v5755_v13 = vpop.f32.mrb[14].mxu1 }
 0x1f1   : > { %v5757_v63 = vpop.f32.mrb[15].mxu1 }
 0x1f7   : > { %v4102_v57 = vpop.f32.mrb[0].mxu0 }
 0x1f8   : > { %v4148_v49 = vadd.f32 %v4102_v57, %v3862_v35  ;;  %v2821_v42 = vpop.f32.mrb[1].mxu0 }
 0x1f9   : > { %v4149_v51 = vadd.f32 %v2821_v42, %v1497_v44  ;;  %v4103_v33 = vpop.f32.mrb[2].mxu0 }
 0x1fa   : > { %v4150_v26 = vadd.f32 %v4103_v33, %v3863_v0  ;;  %v2824_v55 = vpop.f32.mrb[3].mxu0  ;;  %v2989_v56 = vadd.f32 %v4148_v49, %v5768_v29 }
 0x1fb   : > { %v2987_v54 = vadd.f32 %v4149_v51, %v5768_v29  ;;  %v4151_v1 = vadd.f32 %v2824_v55, %v1500_v48 }
 0x1fc   : > { %v2990_v37 = vadd.f32 %v4150_v26, %v5768_v29  ;;  %v3213_v62 = vmul.f32 %v3064_v59, %v2989_v56 }
 0x1fd   : > { %v2988_v5 = vadd.f32 %v4151_v1, %v5768_v29  ;;  %v3211_v4 = vmul.f32 %v3054_v28, %v2987_v54 }
 0x1fe   : > { %v3214_v7 = vmul.f32 %v3069_v6, %v2990_v37 }
 0x1ff   : > { %v3212_v34 = vmul.f32 %v3059_v47, %v2988_v5  ;;  %v4106_v32 = vpop.f32.mrb[4].mxu0 }
 0x200   : > { %v4152_v9 = vadd.f32 %v4106_v32, %v3866_v22  ;;  %v2837_v30 = vpop.f32.mrb[5].mxu0  ;;  %v3134_v22 = vpop.permute.xlu0 %3133 }
 0x201   : > { %v3243_v61 = vadd.f32 %v3212_v34, %v3211_v4  ;;  %v4153_v40 = vadd.f32 %v2837_v30, %v1513_v16  ;;  %v4107_v15 = vpop.f32.mrb[6].mxu0 }
 0x202   : > { %v4154_v8 = vadd.f32 %v4107_v15, %v3867_v50  ;;  %v2840_v23 = vpop.f32.mrb[7].mxu0  ;;  %v2993_v36 = vadd.f32 %v4152_v9, %v5768_v29 }
 0x203   : > { %v3244_v46 = vadd.f32 %v3243_v61, %v3213_v62  ;;  %v2991_v58 = vadd.f32 %v4153_v40, %v5768_v29  ;;  %v4155_v39 = vadd.f32 %v2840_v23, %v1516_v60  ;;  %v5786_v60 = vpop.permute.xlu1 %3138 }
 0x204   : > { %v2994_v44 = vadd.f32 %v4154_v8, %v5768_v29  ;;  %v3217_v47 = vmul.f32 %v3084_v20, %v2993_v36  ;;  %v3144_v20 = vpop.permute.xlu0 %3143 }
 0x205   : > { %v3215_v18 = vmul.f32 %v3074_v24, %v2991_v58  ;;  %v3245_v11 = vadd.f32 %v3244_v46, %v3214_v7  ;;  %v2992_v31 = vadd.f32 %v4155_v39, %v5768_v29 }
 0x206   : > { %v3218_v24 = vmul.f32 %v3089_v14, %v2994_v44 }
 0x207   : > { %v3246_v35 = vadd.f32 %v3245_v11, %v3215_v18  ;;  %v3216_v0 = vmul.f32 %v3079_v2, %v2992_v31  ;;  %v4110_v28 = vpop.f32.mrb[8].mxu0  ;;  %v3149_v56 = vpop.permute.xlu1 %3148 }
 0x208   : > { %v4156_v48 = vadd.f32 %v4110_v28, %v3870_v45  ;;  %v2853_v59 = vpop.f32.mrb[9].mxu0  ;;  %v3154_v61 = vpop.permute.xlu0 %3153 }
 0x209   : > { %v3247_v16 = vadd.f32 %v3246_v35, %v3216_v0  ;;  %v4157_v6 = vadd.f32 %v2853_v59, %v1529_v21  ;;  %v4111_v50 = vpop.f32.mrb[10].mxu0 }
 0x20a   : > { %v4158_v57 = vadd.f32 %v4111_v50, %v3871_v43  ;;  %v2856_v49 = vpop.f32.mrb[11].mxu0  ;;  %v2997_v2 = vadd.f32 %v4156_v48, %v5768_v29 }
 0x20b   : > { %v3248_v42 = vadd.f32 %v3247_v16, %v3217_v47  ;;  %v2995_v51 = vadd.f32 %v4157_v6, %v5768_v29  ;;  %v4159_v33 = vadd.f32 %v2856_v49, %v5749_v53 }
 0x20c   : > { %v2998_v21 = vadd.f32 %v4158_v57, %v5768_v29  ;;  %v3221_v4 = vmul.f32 %v5761_v25, %v2997_v2 }
 0x20d   : > { %v3219_v26 = vmul.f32 %v3094_v52, %v2995_v51  ;;  %v3249_v45 = vadd.f32 %v3248_v42, %v3218_v24  ;;  %v2996_v55 = vadd.f32 %v4159_v33, %v5768_v29 }
 0x20e   : > { %v3222_v9 = vmul.f32 %v5763_v12, %v2998_v21 }
 0x20f   : > { %v3250_v54 = vadd.f32 %v3249_v45, %v3219_v26  ;;  %v3220_v1 = vmul.f32 %v5759_v3, %v2996_v55  ;;  %v4114_v43 = vpop.f32.mrb[12].mxu0 }
 0x210   : > { %v4160_v14 = vadd.f32 %v4114_v43, %v5751_v10  ;;  %v2869_v5 = vpop.f32.mrb[13].mxu0 }
 0x211   : > { %v3251_v53 = vadd.f32 %v3250_v54, %v3220_v1  ;;  %v4161_v37 = vadd.f32 %v2869_v5, %v5753_v19  ;;  %v4115_v52 = vpop.f32.mrb[14].mxu0  ;;  %v3159_v19 = vpop.permute.xlu1 %3158 }
 0x212   : > { %v4162_v34 = vadd.f32 %v4115_v52, %v5755_v13  ;;  %v2872_v32 = vpop.f32.mrb[15].mxu0  ;;  %v3001_v10 = vadd.f32 %v4160_v14, %v5768_v29 }
 0x213   : > { %v3252_v30 = vadd.f32 %v3251_v53, %v3221_v4  ;;  %v2999_v62 = vadd.f32 %v4161_v37, %v5768_v29  ;;  %v4163_v3 = vadd.f32 %v2872_v32, %v5757_v63 }
 0x214   : > { %v3002_v13 = vadd.f32 %v4162_v34, %v5768_v29  ;;  %v3225_v36 = vmul.f32 %v5778_v38, %v3001_v10 }
 0x215   : > { %v3223_v40 = vmul.f32 %v5771_v27, %v2999_v62  ;;  %v3253_v25 = vadd.f32 %v3252_v30, %v3222_v9  ;;  %v3000_v15 = vadd.f32 %v4163_v3, %v5768_v29  ;;  %v3169_v38 = vpop.permute.xlu1 %3168 }
 0x216   : > { %v3926_v8 = vpop.f32.mrb[16].mxu1  ;;  %v3226_v0 = vmul.f32 %v5781_v41, %v3002_v13 }
 0x217   : > { %v3254_v23 = vadd.f32 %v3253_v25, %v3223_v40  ;;  %v3224_v12 = vmul.f32 %v5775_v17, %v3000_v15  ;;  %v4118_v7 = vpop.f32.mrb[16].mxu0  ;;  %v1829_v46 = vpop.f32.mrb[17].mxu1 }
 0x218   : > { %v4164_v58 = vadd.f32 %v4118_v7, %v3926_v8  ;;  %v2885_v39 = vpop.f32.mrb[17].mxu0  ;;  %v3927_v63 = vpop.f32.mrb[18].mxu1 }
 0x219   : > { %v3255_v18 = vadd.f32 %v3254_v23, %v3224_v12  ;;  %v4165_v11 = vadd.f32 %v2885_v39, %v1829_v46  ;;  %v4119_v27 = vpop.f32.mrb[18].mxu0  ;;  %v1832_v31 = vpop.f32.mrb[19].mxu1 }
 0x21a   : > { %v4166_v35 = vadd.f32 %v4119_v27, %v3927_v63  ;;  %v2888_v44 = vpop.f32.mrb[19].mxu0  ;;  %v3164_v17 = vpop.permute.xlu0 %3163  ;;  %v3005_v47 = vadd.f32 %v4164_v58, %v5768_v29 }
 0x21b   : > { %v3256_v28 = vadd.f32 %v3255_v18, %v3225_v36  ;;  %v3003_v48 = vadd.f32 %v4165_v11, %v5768_v29  ;;  %v4167_v59 = vadd.f32 %v2888_v44, %v1832_v31  ;;  %v3179_v9 = vpop.permute.xlu1 %3178 }
 0x21c   : > { %v3006_v24 = vadd.f32 %v4166_v35, %v5768_v29  ;;  %v3229_v45 = vmul.f32 %v3144_v20, %v3005_v47 }
 0x21d   : > { %v3227_v16 = vmul.f32 %v3134_v22, %v3003_v48  ;;  %v3257_v6 = vadd.f32 %v3256_v28, %v3226_v0  ;;  %v3004_v50 = vadd.f32 %v4167_v59, %v5768_v29 }
 0x21e   : > { %v3930_v57 = vpop.f32.mrb[20].mxu1  ;;  %v3230_v14 = vmul.f32 %v3149_v56, %v3006_v24  ;;  %v3174_v37 = vpop.permute.xlu0 %3173 }
 0x21f   : > { %v3258_v49 = vadd.f32 %v3257_v6, %v3227_v16  ;;  %v3228_v42 = vmul.f32 %v5786_v60, %v3004_v50  ;;  %v4122_v51 = vpop.f32.mrb[20].mxu0  ;;  %v1845_v41 = vpop.f32.mrb[21].mxu1 }
 0x220   : > { %v4168_v33 = vadd.f32 %v4122_v51, %v3930_v57  ;;  %v2901_v2 = vpop.f32.mrb[21].mxu0  ;;  %v3931_v26 = vpop.f32.mrb[22].mxu1 }
 0x221   : > { %v3259_v55 = vadd.f32 %v3258_v49, %v3228_v42  ;;  %v4169_v54 = vadd.f32 %v2901_v2, %v1845_v41  ;;  %v4123_v21 = vpop.f32.mrb[22].mxu0  ;;  %v1848_v22 = vpop.f32.mrb[23].mxu1 }
 0x222   : > { %v4170_v1 = vadd.f32 %v4123_v21, %v3931_v26  ;;  %v2904_v43 = vpop.f32.mrb[23].mxu0  ;;  %v3009_v60 = vadd.f32 %v4168_v33, %v5768_v29  ;;  %v3184_v18 = vpop.permute.xlu0 %3183 }
 0x223   : > { %v3260_v5 = vadd.f32 %v3259_v55, %v3229_v45  ;;  %v3007_v4 = vadd.f32 %v4169_v54, %v5768_v29  ;;  %v4171_v53 = vadd.f32 %v2904_v43, %v1848_v22  ;;  %v3189_v35 = vpop.permute.xlu1 %3188 }
 0x224   : > { %v3010_v62 = vadd.f32 %v4170_v1, %v5768_v29  ;;  %v3233_v8 = vmul.f32 %v3164_v17, %v3009_v60 }
 0x225   : > { %v3231_v52 = vmul.f32 %v3154_v61, %v3007_v4  ;;  %v3261_v34 = vadd.f32 %v3260_v5, %v3230_v14  ;;  %v3008_v32 = vadd.f32 %v4171_v53, %v5768_v29 }
 0x226   : > { %v3934_v20 = vpop.f32.mrb[24].mxu1  ;;  %v3234_v58 = vmul.f32 %v3169_v38, %v3010_v62  ;;  %v3194_v42 = vpop.permute.xlu0 %3193 }
 0x227   : > { %v3262_v30 = vadd.f32 %v3261_v34, %v3231_v52  ;;  %v3232_v3 = vmul.f32 %v3159_v19, %v3008_v32  ;;  %v4126_v10 = vpop.f32.mrb[24].mxu0  ;;  %v1861_v40 = vpop.f32.mrb[25].mxu1 }
 0x228   : > { %v4172_v56 = vadd.f32 %v4126_v10, %v3934_v20  ;;  %v2917_v25 = vpop.f32.mrb[25].mxu0  ;;  %v3935_v15 = vpop.f32.mrb[26].mxu1  ;;  %v3280_v10 = vld [vmem:[%s4804_s29] sm:$0x1] }
 0x229   : > { %v3263_v23 = vadd.f32 %v3262_v30, %v3232_v3  ;;  %v4173_v13 = vadd.f32 %v2917_v25, %v1861_v40  ;;  %v4127_v12 = vpop.f32.mrb[26].mxu0  ;;  %v1864_v7 = vpop.f32.mrb[27].mxu1 }
 0x22a   : > { %v4174_v61 = vadd.f32 %v4127_v12, %v3935_v15  ;;  %v2920_v46 = vpop.f32.mrb[27].mxu0  ;;  %v3013_v19 = vadd.f32 %v4172_v56, %v5768_v29  ;;  %v3199_v55 = vpop.permute.xlu1 %3198 }
 0x22b   : > { %v3264_v39 = vadd.f32 %v3263_v23, %v3233_v8  ;;  %v3011_v63 = vadd.f32 %v4173_v13, %v5768_v29  ;;  %v4175_v36 = vadd.f32 %v2920_v46, %v1864_v7  ;;  %v3204_v4 = vpop.permute.xlu0 %3203 }
 0x22c   : > { %v3014_v28 = vadd.f32 %v4174_v61, %v5768_v29  ;;  %v3237_v50 = vmul.f32 %v3184_v18, %v3013_v19 }
 0x22d   : > { %v3235_v11 = vmul.f32 %v3174_v37, %v3011_v63  ;;  %v3265_v27 = vadd.f32 %v3264_v39, %v3234_v58  ;;  %v3012_v31 = vadd.f32 %v4175_v36, %v5768_v29 }
 0x22e   : > { %v3938_v44 = vpop.f32.mrb[28].mxu1  ;;  %v3238_v33 = vmul.f32 %v3189_v35, %v3014_v28  ;;  %v3209_v60 = vpop.permute.xlu1 %3208 }
 0x22f   : > { %v3266_v0 = vadd.f32 %v3265_v27, %v3235_v11  ;;  %v3236_v48 = vmul.f32 %v3179_v9, %v3012_v31  ;;  %v4130_v59 = vpop.f32.mrb[28].mxu0  ;;  %v1877_v17 = vpop.f32.mrb[29].mxu1 }
 0x230   : > { %v4176_v47 = vadd.f32 %v4130_v59, %v3938_v44  ;;  %v2933_v16 = vpop.f32.mrb[29].mxu0  ;;  %v3939_v6 = vpop.f32.mrb[30].mxu1 }
 0x231   : > { %v3267_v38 = vadd.f32 %v3266_v0, %v3236_v48  ;;  %v4177_v57 = vadd.f32 %v2933_v16, %v1877_v17  ;;  %v4131_v49 = vpop.f32.mrb[30].mxu0  ;;  %v1880_v24 = vpop.f32.mrb[31].mxu1 }
 0x232   : > { %v4178_v51 = vadd.f32 %v4131_v49, %v3939_v6  ;;  %v2936_v41 = vpop.f32.mrb[31].mxu0  ;;  %v3017_v54 = vadd.f32 %v4176_v47, %v5768_v29 }
 0x233   : > { %v3268_v2 = vadd.f32 %v3267_v38, %v3237_v50  ;;  %v3015_v26 = vadd.f32 %v4177_v57, %v5768_v29  ;;  %v4179_v45 = vadd.f32 %v2936_v41, %v1880_v24 }
 0x234   : > { %v3018_v14 = vadd.f32 %v4178_v51, %v5768_v29  ;;  %v3241_v53 = vmul.f32 %v3204_v4, %v3017_v54 }
 0x235   : > { %v3239_v21 = vmul.f32 %v3194_v42, %v3015_v26  ;;  %v3269_v22 = vadd.f32 %v3268_v2, %v3238_v33  ;;  %v3016_v1 = vadd.f32 %v4179_v45, %v5768_v29 }
 0x236   : > { %v3242_v52 = vmul.f32 %v3209_v60, %v3018_v14 }
 0x237   : > { %v3270_v43 = vadd.f32 %v3269_v22, %v3239_v21  ;;  %v3240_v5 = vmul.f32 %v3199_v55, %v3016_v1 }
 0x239   : > { %v3271_v37 = vadd.f32 %v3270_v43, %v3240_v5 }
 0x23b   : > { %v3272_v34 = vadd.f32 %v3271_v37, %v3241_v53 }
 0x23d   : > { %v3273_v32 = vadd.f32 %v3272_v34, %v3242_v52 }
 0x23f   : > { %v3274_v9 = vrot.slane %v3273_v32, 4 }
 0x241   : > { %v3275_v20 = vadd.f32 %v3274_v9, %v3273_v32 }
 0x243   : > { %v3276_v30 = vrot.slane %v3275_v20, 2 }
 0x245   : > { %v3277_v62 = vadd.f32 %v3276_v30, %v3275_v20 }
 0x247   : > { %v3278_v3 = vrot.slane %v3277_v62, 1 }
 0x249   : > { %v3279_v29 = vadd.f32 %v3278_v3, %v3277_v62 }
 0x24b   : > { %v3281_v40 = vadd.f32 %v3280_v10, %v3279_v29 }
 0x24d   : > { %3282 = vst [vmem:[%s4804_s29] sm:$0x1] %v3281_v40 }
 0x24e   : > { %4609 = shalt.err (!%p4606_p7)
}
 0x24f   : > { %s4610_s6 = scalar_lea.hbm %s5831_s30, 16  ;;  %s4614_s11 = scalar_lea.hbm %s5891_s4, 32 }
 0x250   : > { %p4611_p8 = scmp.ne.s32.totalorder %s5831_s30, %s4610_s6  ;;  %p4615_p12 = scmp.lt.u32.totalorder %s5831_s30, %s5891_s4 }
 0x251   : > { %p4616_p13 = scmp.lt.u32.totalorder %s4614_s11, %s4610_s6  ;;  %p4618_p1 = scmp.lt.u32.totalorder %s4610_s6, %s5831_s30 }
 0x252   : > { %p4612_p10 = pnand %p4611_p8, %p4769_p3 }
 0x253   : > { %p4617_p0 = por %p4616_p13, %p4615_p12 }
 0x254   : > { %p4613_p11 = pneg %p4612_p10 }
 0x255   : > { %p4619_p2 = por %p4618_p1, %p4617_p0 }
 0x257   : > { %p4620_p4 = pnand %p4619_p2, %p4613_p11 }
 0x259   : > { %4623 = shalt.err (!%p4620_p4)
}
 0x25a   : > { %4405 = dma.vmem_to_hbm [thread:$0]  (%p4769_p3), %s5833_s12, 16, %s5831_s30, %s3284_s7  }
 0x25b PF: > { %p4411_p5 = scmp.ge.s32.totalorder %s4690_s22, 2  ;;  %s3308_s14 = sand.u32 1, %s4662_s15  }
 0x25c   : > { %s3309_s23 = scalar_lea.sflag [#allocation3], %s3308_s14 }
 0x25d   : > { %p4408_p6 = pnand %p4411_p5, %p4779_p9 }
 0x25f   : > { %4657 = dma.done.wait (!%p4408_p6), %s3309_s23, 16  }
 0x260   : > { %4659 = vsyncadd (!%p4408_p6), %s3309_s23, 4294967280  ;;  %s17_s22 = sadd.s32 1, %s4690_s22   ;;  %s5969_s15 = smov %s4666_s16 }
 0x261   : > { %p14_p7 = scmp.ge.s32.totalorder %s17_s22, 6   ;;  %s5970_s16 = smov %s4670_s17 }
 0x262   : > { %s5971_s17 = smov %s4787_s5  ;;  %s5972_s18 = smov %s4682_s20 }
 0x263   : > { %s5973_s19 = smov %s4686_s21  ;;  %s5974_s20 = smov %s5977_s25 }
 0x264   : > { %s5975_s21 = smov %s5981_s26  ;;  %16 = sbr.rel (!%p14_p7) target bundleno = 5 (0x5), region = 78 }
 0x26b   :  { %3313 = vsyncpa [#allocation3], 1 }
 0x26c   :  { %3315 = vsyncpa [#allocation3 + $0x1], 1 }

</bundles_post_ra>
